<compile_context>
chip_gen: v5e
topology: v5e:2x2
jax: 0.10.0
libtpu: 0.0.40
codegen_flags: <defaults>
</compile_context>

<pallas_src>
import functools

import numpy as np
import jax
import jax.numpy as jnp
from jax import lax
from jax.experimental import pallas as pl
from jax.experimental.pallas import tpu as pltpu


def _round_up(x, m):
    return ((x + m - 1) // m) * m


def _vq_kernel(x_ref, e_ref, et_ref, esq_ref,
               q_ref, counts_ref, dw_ref, sqerr_ref,
               *, n_real, tile_n, needs_row_mask, mxu_dtype):
    """One grid step: a (TN, Dp) tile of flat_x against the full padded codebook.

    Grid = (num_splits ["parallel"], inner_tiles ["arbitrary"]).

    Outputs:
      q_ref      (TN, Dp)    : quantized vectors for this tile (per-tile block)
      counts_ref (1, 1, Kp)  : one-hot column sums, accumulated per split
      dw_ref     (1, Kp, Dp) : encodings^T @ flat_x, accumulated per split
      sqerr_ref  (1, 1, 1)   : sum((x - quantized)^2), accumulated per split
    """
    c = pl.program_id(0)      # split axis (one per TensorCore on v7x)
    j = pl.program_id(1)      # reduction axis over N tiles

    # ---- zero the per-split accumulators once, then accumulate unconditionally
    @pl.when(j == 0)
    def _():
        counts_ref[...] = jnp.zeros_like(counts_ref)
        dw_ref[...] = jnp.zeros_like(dw_ref)
        sqerr_ref[...] = jnp.zeros_like(sqerr_ref)

    x = x_ref[...].astype(jnp.float32)                   # (TN, Dp)
    esq = esq_ref[...]                                    # (1, Kp); padded cols = 1e30

    # MXU operands (optionally bf16 on v6e/v7x; f32 default for exactness).
    x_m = x.astype(mxu_dtype)
    e_m = e_ref[...].astype(mxu_dtype)                    # (Kp, Dp)
    et_m = et_ref[...].astype(mxu_dtype)                  # (Dp, Kp), pre-transposed

    # squared L2 distances: ||x||^2 + ||e||^2 - 2 x @ e^T  -> (TN, Kp)
    xsq = jnp.sum(x * x, axis=1, keepdims=True)           # (TN, 1)
    xe = jnp.dot(x_m, et_m, preferred_element_type=jnp.float32)   # (TN, Kp)
    d = xsq + esq - 2.0 * xe

    # first-argmin along K (matches torch.argmin tie-breaking)
    dmin = jnp.min(d, axis=1, keepdims=True)               # (TN, 1)
    col = lax.broadcasted_iota(jnp.int32, d.shape, 1)      # (TN, Kp)
    idx = jnp.min(jnp.where(d == dmin, col, d.shape[1]), axis=1, keepdims=True)
    one_hot = (col == idx).astype(jnp.float32)             # (TN, Kp)

    if needs_row_mask:
        # Rows >= n_real are padding: drop their one-hot so counts/dw/sqerr and
        # q (via the one-hot matmul) get zero contribution from them.
        row0 = (c * pl.num_programs(1) + j) * tile_n
        rid = row0 + lax.broadcasted_iota(jnp.int32, d.shape, 0)
        one_hot = jnp.where(rid < n_real, one_hot, 0.0)

    one_hot_m = one_hot.astype(mxu_dtype)

    # embedding gather via one-hot matmul (exactly one 1 per real row)
    q = jnp.dot(one_hot_m, e_m, preferred_element_type=jnp.float32)   # (TN, Dp)
    q_ref[...] = q.astype(q_ref.dtype)

    counts_ref[...] += jnp.sum(one_hot, axis=0, keepdims=True)[None]  # (1,1,Kp)
    dw_ref[...] += lax.dot_general(
        one_hot_m, x_m, (((0,), (0,)), ((), ())),
        preferred_element_type=jnp.float32)[None]                      # (1,Kp,Dp)

    # sum_i ||x_i - q_i||^2 == sum_i d[i, idx_i]; the selected entries of
    # one_hot * d are exactly those, clamp >=0 against f32 cancellation.
    sqerr_ref[...] += jnp.sum(jnp.maximum(one_hot * d, 0.0),
                              keepdims=True)[None]                     # (1,1,1)


def vq_hot_path(flat_x, embeddings, *, tile_n=256, num_splits=2,
                mxu_dtype=jnp.float32):
    """Pallas entry point for the VQ hot path.

    Returns (quantized_flat (N,D) f32, counts (K,), dw (K,D), sqerr scalar).
    """
    N, D = flat_x.shape
    K, De = embeddings.shape
    assert D == De

    # Lane-dense padding of the feature and codebook axes.
    Dp = _round_up(D, 128)
    Kp = _round_up(K, 128)

    # 128-aligned N tiles; shrink for tiny inputs so padding stays bounded.
    per_split = -(-N // num_splits)
    tile_n = max(128, min(tile_n, _round_up(per_split, 128)))
    Np = _round_up(N, tile_n * num_splits)
    inner_tiles = Np // (tile_n * num_splits)
    needs_row_mask = (Np != N)

    xf = flat_x.astype(jnp.float32)
    ef = embeddings.astype(jnp.float32)
    x_pad = jnp.zeros((Np, Dp), jnp.float32).at[:N, :D].set(xf)
    e_pad = jnp.zeros((Kp, Dp), jnp.float32).at[:K, :D].set(ef)
    et_pad = e_pad.T                                   # (Dp, Kp): transpose once, on host
    # Padded codebook rows get a huge ||e||^2 so they can never win the argmin.
    esq_pad = jnp.full((1, Kp), 1e30, jnp.float32).at[0, :K].set(
        jnp.sum(ef * ef, axis=1))

    kernel = functools.partial(
        _vq_kernel, n_real=N, tile_n=tile_n,
        needs_row_mask=needs_row_mask, mxu_dtype=mxu_dtype)

    q_pad, counts_p, dw_p, sqerr_p = pl.pallas_call(
        kernel,
        out_shape=(
            jax.ShapeDtypeStruct((Np, Dp), jnp.float32),                # quantized
            jax.ShapeDtypeStruct((num_splits, 1, Kp), jnp.float32),     # counts / split
            jax.ShapeDtypeStruct((num_splits, Kp, Dp), jnp.float32),    # dw / split
            jax.ShapeDtypeStruct((num_splits, 1, 1), jnp.float32),      # sqerr / split
        ),
        grid_spec=pltpu.PrefetchScalarGridSpec(
            num_scalar_prefetch=0,
            grid=(num_splits, inner_tiles),
            in_specs=[
                pl.BlockSpec((tile_n, Dp), lambda c, j: (c * inner_tiles + j, 0)),
                pl.BlockSpec((Kp, Dp), lambda c, j: (0, 0)),   # codebook (K,D)
                pl.BlockSpec((Dp, Kp), lambda c, j: (0, 0)),   # codebook^T (D,K)
                pl.BlockSpec((1, Kp), lambda c, j: (0, 0)),    # ||e||^2
            ],
            out_specs=(
                pl.BlockSpec((tile_n, Dp), lambda c, j: (c * inner_tiles + j, 0)),
                pl.BlockSpec((1, 1, Kp), lambda c, j: (c, 0, 0)),
                pl.BlockSpec((1, Kp, Dp), lambda c, j: (c, 0, 0)),
                pl.BlockSpec((1, 1, 1), lambda c, j: (c, 0, 0)),
            ),
        ),
        compiler_params=pltpu.CompilerParams(
            dimension_semantics=("parallel", "arbitrary")),
    )(x_pad, e_pad, et_pad, esq_pad)

    q = q_pad[:N, :D]
    counts = jnp.sum(counts_p, axis=0)[0, :K]
    dw = jnp.sum(dw_p, axis=0)[:K, :D]
    sqerr = jnp.sum(sqerr_p)
    return q, counts, dw, sqerr


def vq_ema_forward(x, state, *, commitment_cost=0.25, decay=0.99,
                   epsilon=1e-5, training=True):
    """Functional equivalent of VectorQuantizerEMA.forward.

    Returns ((quantized, loss, perplexity), new_state). Buffer mutation of the
    PyTorch module (embeddings, EMA hidden states, counters) is expressed as
    the returned `new_state`.
    """
    emb = state["embeddings"]
    K, D = emb.shape
    flat_x = x.reshape(-1, D)
    N = flat_x.shape[0]

    q_flat, counts, dw, sqerr = vq_hot_path(flat_x, emb)
    quantized = q_flat.reshape(x.shape)

    if not training:
        return (quantized, None, None), state

    # --- EMA cluster size (ExponentialMovingAverage semantics) ---
    cs_counter = state["cs_counter"] + 1
    cs_hidden = state["cs_hidden"] - (state["cs_hidden"] - counts) * (1.0 - decay)
    ucs = cs_hidden / (1.0 - decay ** cs_counter)
    n = jnp.sum(ucs)
    ucs = (ucs + epsilon) / (n + K * epsilon) * n

    # --- EMA of dw ---
    dw_counter = state["dw_counter"] + 1
    dw_hidden = state["dw_hidden"] - (state["dw_hidden"] - dw) * (1.0 - decay)
    udw = dw_hidden / (1.0 - decay ** dw_counter)
    new_emb = udw / ucs[:, None]

    # --- losses / stats ---
    e_latent_loss = sqerr / x.size                     # F.mse_loss(x, quantized)
    loss = commitment_cost * e_latent_loss
    quantized_st = x + lax.stop_gradient(quantized - x)  # straight-through value
    avg_probs = counts / N
    perplexity = jnp.exp(-jnp.sum(avg_probs * jnp.log(avg_probs + 1e-6)))

    new_state = dict(
        embeddings=new_emb,
        cs_hidden=cs_hidden, cs_counter=cs_counter,
        dw_hidden=dw_hidden, dw_counter=dw_counter,
    )
    return (quantized_st, loss, perplexity), new_state


def _reference_forward_np(x, emb, commitment_cost, decay, epsilon):
    """NumPy re-implementation of the PyTorch forward (first training step)."""
    x = np.asarray(x, np.float32)
    emb = np.asarray(emb, np.float32)
    K, D = emb.shape
    flat = x.reshape(-1, D)
    d = (flat ** 2).sum(1, keepdims=True) + (emb ** 2).sum(1)[None, :] \
        - 2.0 * flat @ emb.T
    idx = d.argmin(1)
    quant = emb[idx].reshape(x.shape)
    onehot = np.eye(K, dtype=np.float32)[idx]
    counts = onehot.sum(0)

    cs_hidden = np.zeros((K,), np.float32)
    cs_hidden = cs_hidden - (cs_hidden - counts) * (1 - decay)
    ucs = cs_hidden / (1 - decay ** 1)
    n = ucs.sum()
    ucs = (ucs + epsilon) / (n + K * epsilon) * n

    dw = onehot.T @ flat
    dw_hidden = np.zeros((K, D), np.float32)
    dw_hidden = dw_hidden - (dw_hidden - dw) * (1 - decay)
    udw = dw_hidden / (1 - decay ** 1)
    new_emb = udw / ucs[:, None]

    e_latent = np.mean((x - quant) ** 2)
    loss = commitment_cost * e_latent
    avg_probs = counts / flat.shape[0]
    perp = np.exp(-np.sum(avg_probs * np.log(avg_probs + 1e-6)))
    return quant, loss, perp, new_emb


if __name__ == "__main__":
    B, H, W = 2, 8, 8       # N = 128 flattened vectors
    D, K = 32, 64           # embedding_dim, num_embeddings

    key = jax.random.PRNGKey(0)
    kx, ke = jax.random.split(key)
    x = jax.random.normal(kx, (B, H, W, D), dtype=jnp.float32)
    embeddings = jax.random.normal(ke, (K, D), dtype=jnp.float32)  # torch.randn init

    state = dict(
        embeddings=embeddings,
        cs_hidden=jnp.zeros((K,), jnp.float32), cs_counter=0,
        dw_hidden=jnp.zeros((K, D), jnp.float32), dw_counter=0,
    )

    (quantized, loss, perplexity), new_state = vq_ema_forward(x, state)
    jax.block_until_ready((quantized, loss, perplexity, new_state["embeddings"]))

    # correctness check against a NumPy reference of the PyTorch forward
    ref_q, ref_loss, ref_perp, ref_emb = _reference_forward_np(
        x, embeddings, commitment_cost=0.25, decay=0.99, epsilon=1e-5)
    np.testing.assert_allclose(np.asarray(quantized), ref_q, rtol=2e-3, atol=2e-3)
    np.testing.assert_allclose(float(loss), float(ref_loss), rtol=2e-3, atol=2e-3)
    np.testing.assert_allclose(float(perplexity), float(ref_perp), rtol=2e-3, atol=2e-3)
    np.testing.assert_allclose(np.asarray(new_state["embeddings"]), ref_emb,
                               rtol=2e-3, atol=2e-3)

    print("KERNEL_OK")
</pallas_src>

<mosaic_0001>
module attributes {stable_mosaic.version = 11 : i64} {
  func.func @_vq_kernel(%arg0: i32, %arg1: i32, %arg2: memref<128x128xf32, #tpu.memory_space<vmem>>, %arg3: memref<128x128xf32, #tpu.memory_space<vmem>>, %arg4: memref<128x128xf32, #tpu.memory_space<vmem>>, %arg5: memref<1x128xf32, #tpu.memory_space<vmem>>, %arg6: memref<128x128xf32, #tpu.memory_space<vmem>>, %arg7: memref<1x1x128xf32, #tpu.memory_space<vmem>>, %arg8: memref<1x128x128xf32, #tpu.memory_space<vmem>>, %arg9: memref<1x1x1xf32, #tpu.memory_space<vmem>>) attributes {dimension_semantics = [#tpu.dimension_semantics<parallel>, #tpu.dimension_semantics<arbitrary>], iteration_bounds = array<i64: 2, 1>, scalar_prefetch = 0 : i64, scratch_operands = 0 : i64, tpu.core_type = #tpu.core_type<tc>, window_params = [{transform_indices = @transform_0, window_bounds = array<i64: 128, 128>}, {pipeline_mode = #tpu.pipeline_mode<synchronous>, transform_indices = @transform_1, window_bounds = array<i64: 128, 128>}, {pipeline_mode = #tpu.pipeline_mode<synchronous>, transform_indices = @transform_2, window_bounds = array<i64: 128, 128>}, {pipeline_mode = #tpu.pipeline_mode<synchronous>, transform_indices = @transform_3, window_bounds = array<i64: 1, 128>}, {transform_indices = @transform_4, window_bounds = array<i64: 128, 128>}, {transform_indices = @transform_5, window_bounds = array<i64: 1, 1, 128>}, {transform_indices = @transform_6, window_bounds = array<i64: 1, 128, 128>}, {transform_indices = @transform_7, window_bounds = array<i64: 1, 1, 1>}]} {
    %c0_i32 = arith.constant 0 : i32
    %0 = arith.cmpi eq, %arg1, %c0_i32 : i32
    %1 = arith.extui %0 : i1 to i32
    %c0_i32_0 = arith.constant 0 : i32
    %2 = arith.cmpi ne, %1, %c0_i32_0 : i32
    scf.if %2 {
      %cst_40 = arith.constant 0.000000e+00 : f32
      %65 = vector.broadcast %cst_40 : f32 to vector<1x1x128xf32>
      %c0_41 = arith.constant 0 : index
      %c0_42 = arith.constant 0 : index
      %c0_43 = arith.constant 0 : index
      %66 = vector.load %arg7[%c0_41, %c0_42, %c0_43] : memref<1x1x128xf32, #tpu.memory_space<vmem>>, vector<1x1x128xf32>
      tpu.vector_store %arg7[%c0_41, %c0_42, %c0_43], %65 {strides = array<i32>} : memref<1x1x128xf32, #tpu.memory_space<vmem>>, vector<1x1x128xf32>,
      %cst_44 = arith.constant 0.000000e+00 : f32
      %67 = vector.broadcast %cst_44 : f32 to vector<1x128x128xf32>
      %c0_45 = arith.constant 0 : index
      %c0_46 = arith.constant 0 : index
      %c0_47 = arith.constant 0 : index
      %68 = vector.load %arg8[%c0_45, %c0_46, %c0_47] : memref<1x128x128xf32, #tpu.memory_space<vmem>>, vector<1x128x128xf32>
      tpu.vector_store %arg8[%c0_45, %c0_46, %c0_47], %67 {strides = array<i32>} : memref<1x128x128xf32, #tpu.memory_space<vmem>>, vector<1x128x128xf32>,
      %cst_48 = arith.constant 0.000000e+00 : f32
      %69 = vector.broadcast %cst_48 : f32 to vector<1x1x1xf32>
      %c0_49 = arith.constant 0 : index
      %c0_50 = arith.constant 0 : index
      %c0_51 = arith.constant 0 : index
      %70 = vector.load %arg9[%c0_49, %c0_50, %c0_51] : memref<1x1x1xf32, #tpu.memory_space<vmem>>, vector<1x1x1xf32>
      tpu.vector_store %arg9[%c0_49, %c0_50, %c0_51], %69 {strides = array<i32>} : memref<1x1x1xf32, #tpu.memory_space<vmem>>, vector<1x1x1xf32>,
    } else {
    }
    %c0 = arith.constant 0 : index
    %c0_1 = arith.constant 0 : index
    %3 = vector.load %arg2[%c0, %c0_1] : memref<128x128xf32, #tpu.memory_space<vmem>>, vector<128x128xf32>
    %c0_2 = arith.constant 0 : index
    %c0_3 = arith.constant 0 : index
    %4 = vector.load %arg5[%c0_2, %c0_3] : memref<1x128xf32, #tpu.memory_space<vmem>>, vector<1x128xf32>
    %c0_4 = arith.constant 0 : index
    %c0_5 = arith.constant 0 : index
    %5 = vector.load %arg3[%c0_4, %c0_5] : memref<128x128xf32, #tpu.memory_space<vmem>>, vector<128x128xf32>
    %c0_6 = arith.constant 0 : index
    %c0_7 = arith.constant 0 : index
    %6 = vector.load %arg4[%c0_6, %c0_7] : memref<128x128xf32, #tpu.memory_space<vmem>>, vector<128x128xf32>
    %7 = arith.mulf %3, %3 : vector<128x128xf32>
    %cst = arith.constant dense<0.000000e+00> : vector<128xf32>
    %8 = vector.multi_reduction <add>, %7, %cst [1] : vector<128x128xf32> to vector<128xf32>
    %9 = vector.shape_cast %8 : vector<128xf32> to vector<128x1xf32>
    %cst_8 = arith.constant dense<0.000000e+00> : vector<128x128xf32>
    %10 = tpu.matmul %3, %6, %cst_8 {dimension_numbers = #tpu.dot_dimension_numbers<[1], [0], [0], [1], [0, 0, 1, 1], [], []>} : vector<128x128xf32>, vector<128x128xf32>, vector<128x128xf32> -> vector<128x128xf32>
    %11 = vector.broadcast %9 : vector<128x1xf32> to vector<128x128xf32>
    %12 = vector.broadcast %4 : vector<1x128xf32> to vector<128x128xf32>
    %13 = arith.addf %11, %12 : vector<128x128xf32>
    %cst_9 = arith.constant 2.000000e+00 : f32
    %14 = vector.broadcast %cst_9 : f32 to vector<128x128xf32>
    %15 = arith.mulf %14, %10 : vector<128x128xf32>
    %16 = arith.subf %13, %15 : vector<128x128xf32>
    %cst_10 = arith.constant dense<0x7F800000> : vector<128xf32>
    %17 = vector.multi_reduction <minimumf>, %16, %cst_10 [1] : vector<128x128xf32> to vector<128xf32>
    %18 = vector.shape_cast %17 : vector<128xf32> to vector<128x1xf32>
    %19 = tpu.iota {dimensions = array<i32: 1>} : vector<128x128xi32>
    %20 = vector.broadcast %18 : vector<128x1xf32> to vector<128x128xf32>
    %21 = arith.cmpf oeq, %16, %20 : vector<128x128xf32>
    %c128_i32 = arith.constant 128 : i32
    %22 = vector.broadcast %c128_i32 : i32 to vector<128x128xi32>
    %23 = arith.select %21, %19, %22 : vector<128x128xi1>, vector<128x128xi32>
    %cst_11 = arith.constant dense<2147483647> : vector<128xi32>
    %24 = vector.multi_reduction <minsi>, %23, %cst_11 [1] : vector<128x128xi32> to vector<128xi32>
    %25 = vector.shape_cast %24 : vector<128xi32> to vector<128x1xi32>
    %26 = vector.broadcast %25 : vector<128x1xi32> to vector<128x128xi32>
    %27 = arith.cmpi eq, %19, %26 : vector<128x128xi32>
    %28 = arith.extui %27 : vector<128x128xi1> to vector<128x128xi32>
    %29 = arith.sitofp %28 : vector<128x128xi32> to vector<128x128xf32>
    %c1_i32 = arith.constant 1 : i32
    %30 = arith.muli %arg0, %c1_i32 : i32
    %31 = arith.addi %30, %arg1 : i32
    %c128_i32_12 = arith.constant 128 : i32
    %32 = arith.muli %31, %c128_i32_12 : i32
    %33 = tpu.iota {dimensions = array<i32: 0>} : vector<128x128xi32>
    %34 = vector.broadcast %32 : i32 to vector<128x128xi32>
    %35 = arith.addi %34, %33 : vector<128x128xi32>
    %c128_i32_13 = arith.constant 128 : i32
    %36 = vector.broadcast %c128_i32_13 : i32 to vector<128x128xi32>
    %37 = arith.cmpi slt, %35, %36 : vector<128x128xi32>
    %cst_14 = arith.constant 0.000000e+00 : f32
    %38 = vector.broadcast %cst_14 : f32 to vector<128x128xf32>
    %39 = arith.select %37, %29, %38 : vector<128x128xi1>, vector<128x128xf32>
    %cst_15 = arith.constant dense<0.000000e+00> : vector<128x128xf32>
    %40 = tpu.matmul %39, %5, %cst_15 {dimension_numbers = #tpu.dot_dimension_numbers<[1], [0], [0], [1], [0, 0, 1, 1], [], []>} : vector<128x128xf32>, vector<128x128xf32>, vector<128x128xf32> -> vector<128x128xf32>
    %c0_16 = arith.constant 0 : index
    %c0_17 = arith.constant 0 : index
    %41 = vector.load %arg6[%c0_16, %c0_17] : memref<128x128xf32, #tpu.memory_space<vmem>>, vector<128x128xf32>
    tpu.vector_store %arg6[%c0_16, %c0_17], %40 {strides = array<i32>} : memref<128x128xf32, #tpu.memory_space<vmem>>, vector<128x128xf32>,
    %c0_18 = arith.constant 0 : index
    %c0_19 = arith.constant 0 : index
    %c0_20 = arith.constant 0 : index
    %42 = vector.load %arg7[%c0_18, %c0_19, %c0_20] : memref<1x1x128xf32, #tpu.memory_space<vmem>>, vector<1x1x128xf32>
    %cst_21 = arith.constant dense<0.000000e+00> : vector<128xf32>
    %43 = vector.multi_reduction <add>, %39, %cst_21 [0] : vector<128x128xf32> to vector<128xf32>
    %44 = vector.shape_cast %43 : vector<128xf32> to vector<1x128xf32>
    %45 = vector.shape_cast %44 : vector<1x128xf32> to vector<1x1x128xf32>
    %46 = arith.addf %42, %45 : vector<1x1x128xf32>
    %c0_22 = arith.constant 0 : index
    %c0_23 = arith.constant 0 : index
    %c0_24 = arith.constant 0 : index
    %47 = vector.load %arg7[%c0_22, %c0_23, %c0_24] : memref<1x1x128xf32, #tpu.memory_space<vmem>>, vector<1x1x128xf32>
    tpu.vector_store %arg7[%c0_22, %c0_23, %c0_24], %46 {strides = array<i32>} : memref<1x1x128xf32, #tpu.memory_space<vmem>>, vector<1x1x128xf32>,
    %c0_25 = arith.constant 0 : index
    %c0_26 = arith.constant 0 : index
    %c0_27 = arith.constant 0 : index
    %48 = vector.load %arg8[%c0_25, %c0_26, %c0_27] : memref<1x128x128xf32, #tpu.memory_space<vmem>>, vector<1x128x128xf32>
    %cst_28 = arith.constant dense<0.000000e+00> : vector<128x128xf32>
    %49 = tpu.matmul %39, %3, %cst_28 {dimension_numbers = #tpu.dot_dimension_numbers<[0], [0], [1], [1], [0, 1, 1, 1], [], []>} : vector<128x128xf32>, vector<128x128xf32>, vector<128x128xf32> -> vector<128x128xf32>
    %50 = vector.shape_cast %49 : vector<128x128xf32> to vector<1x128x128xf32>
    %51 = arith.addf %48, %50 : vector<1x128x128xf32>
    %c0_29 = arith.constant 0 : index
    %c0_30 = arith.constant 0 : index
    %c0_31 = arith.constant 0 : index
    %52 = vector.load %arg8[%c0_29, %c0_30, %c0_31] : memref<1x128x128xf32, #tpu.memory_space<vmem>>, vector<1x128x128xf32>
    tpu.vector_store %arg8[%c0_29, %c0_30, %c0_31], %51 {strides = array<i32>} : memref<1x128x128xf32, #tpu.memory_space<vmem>>, vector<1x128x128xf32>,
    %c0_32 = arith.constant 0 : index
    %c0_33 = arith.constant 0 : index
    %c0_34 = arith.constant 0 : index
    %53 = vector.load %arg9[%c0_32, %c0_33, %c0_34] : memref<1x1x1xf32, #tpu.memory_space<vmem>>, vector<1x1x1xf32>
    %54 = arith.mulf %39, %16 : vector<128x128xf32>
    %cst_35 = arith.constant 0.000000e+00 : f32
    %55 = vector.broadcast %cst_35 : f32 to vector<128x128xf32>
    %56 = arith.maximumf %54, %55 : vector<128x128xf32>
    %57 = vector.shape_cast %56 : vector<128x128xf32> to vector<1x128x128xf32>
    %cst_36 = arith.constant dense<0.000000e+00> : vector<1xf32>
    %58 = vector.multi_reduction <add>, %57, %cst_36 [1, 2] : vector<1x128x128xf32> to vector<1xf32>
    %59 = vector.shape_cast %58 : vector<1xf32> to vector<1x1x1xf32>
    %60 = vector.extract %59[0, 0, 0] : f32 from vector<1x1x1xf32>
    %61 = vector.broadcast %60 : f32 to vector<1x1xf32>
    %62 = vector.shape_cast %61 : vector<1x1xf32> to vector<1x1x1xf32>
    %63 = arith.addf %53, %62 : vector<1x1x1xf32>
    %c0_37 = arith.constant 0 : index
    %c0_38 = arith.constant 0 : index
    %c0_39 = arith.constant 0 : index
    %64 = vector.load %arg9[%c0_37, %c0_38, %c0_39] : memref<1x1x1xf32, #tpu.memory_space<vmem>>, vector<1x1x1xf32>
    tpu.vector_store %arg9[%c0_37, %c0_38, %c0_39], %63 {strides = array<i32>} : memref<1x1x1xf32, #tpu.memory_space<vmem>>, vector<1x1x1xf32>,
    return
  }
  func.func @transform_0(%arg0: i32, %arg1: i32) -> (i32, i32) {
    %c1_i32 = arith.constant 1 : i32
    %0 = arith.muli %arg0, %c1_i32 : i32
    %1 = arith.addi %0, %arg1 : i32
    %c0_i32 = arith.constant 0 : i32
    %c0_i32_0 = arith.constant 0 : i32
    return %1, %c0_i32 : i32, i32
  }
  func.func @transform_1(%arg0: i32, %arg1: i32) -> (i32, i32) {
    %c0_i32 = arith.constant 0 : i32
    %c0_i32_0 = arith.constant 0 : i32
    %c0_i32_1 = arith.constant 0 : i32
    return %c0_i32, %c0_i32_0 : i32, i32
  }
  func.func @transform_2(%arg0: i32, %arg1: i32) -> (i32, i32) {
    %c0_i32 = arith.constant 0 : i32
    %c0_i32_0 = arith.constant 0 : i32
    %c0_i32_1 = arith.constant 0 : i32
    return %c0_i32, %c0_i32_0 : i32, i32
  }
  func.func @transform_3(%arg0: i32, %arg1: i32) -> (i32, i32) {
    %c0_i32 = arith.constant 0 : i32
    %c0_i32_0 = arith.constant 0 : i32
    %c0_i32_1 = arith.constant 0 : i32
    return %c0_i32, %c0_i32_0 : i32, i32
  }
  func.func @transform_4(%arg0: i32, %arg1: i32) -> (i32, i32) {
    %c1_i32 = arith.constant 1 : i32
    %0 = arith.muli %arg0, %c1_i32 : i32
    %1 = arith.addi %0, %arg1 : i32
    %c0_i32 = arith.constant 0 : i32
    %c0_i32_0 = arith.constant 0 : i32
    return %1, %c0_i32 : i32, i32
  }
  func.func @transform_5(%arg0: i32, %arg1: i32) -> (i32, i32, i32) {
    %c0_i32 = arith.constant 0 : i32
    %c0_i32_0 = arith.constant 0 : i32
    %c0_i32_1 = arith.constant 0 : i32
    return %arg0, %c0_i32, %c0_i32_0 : i32, i32, i32
  }
  func.func @transform_6(%arg0: i32, %arg1: i32) -> (i32, i32, i32) {
    %c0_i32 = arith.constant 0 : i32
    %c0_i32_0 = arith.constant 0 : i32
    %c0_i32_1 = arith.constant 0 : i32
    return %arg0, %c0_i32, %c0_i32_0 : i32, i32, i32
  }
  func.func @transform_7(%arg0: i32, %arg1: i32) -> (i32, i32, i32) {
    %c0_i32 = arith.constant 0 : i32
    %c0_i32_0 = arith.constant 0 : i32
    %c0_i32_1 = arith.constant 0 : i32
    return %arg0, %c0_i32, %c0_i32_0 : i32, i32, i32
  }
}

</mosaic_0001>

<bundles_post_ra>
// kernel: tpu_custom_call.1
= control target key start
LH: loop header
LB: loop body
LE: loop exit
PB: predicated region body
PF: predicated region fallthrough
CT: control target
= control target key end

     0   :  { %s2859_s0 = inlined_call_operand.hbm [shape: f32[256,128], index: 0, kind: input, shape index: {}]   ;;  %s2860_s1 = inlined_call_operand.hbm [shape: f32[128,128], index: 1, kind: input, shape index: {}]   ;;  %s2861_s2 = inlined_call_operand.hbm [shape: f32[128,128], index: 2, kind: input, shape index: {}]   ;;  %s2862_s3 = inlined_call_operand.vmem [shape: f32[1,128], index: 3, kind: input, shape index: {}]   ;;  %s2863_s4 = inlined_call_operand.hbm [shape: f32[256,128], index: 4, kind: output, shape index: {0}]   ;;  %s2864_s5 = inlined_call_operand.hbm [shape: f32[2,1,128], index: 5, kind: output, shape index: {1}]   ;;  %s2865_s6 = inlined_call_operand.hbm [shape: f32[2,128,128], index: 6, kind: output, shape index: {2}]   ;;  %s2866_s7 = inlined_call_operand.vmem [shape: f32[2,1,1], index: 7, kind: output, shape index: {3}]  }
   0x1   :  { %2885 = sst [smem:[#allocation29_spill]] %s2859_s0 }
   0x2   :  { %2886 = sst [smem:[#allocation30_spill]] %s2860_s1 }
   0x3   :  { %2887 = sst [smem:[#allocation31_spill]] %s2861_s2 }
   0x4   :  { %13 = vsyncpa [#allocation3], 0 }
   0x5   :  { %15 = vsyncpa [#allocation3 + $0x1], 0 }
   0x6   :  { %16 = vsyncpa [#allocation6], 0 }
   0x7   :  { %17 = vsyncpa [#allocation4], 0 }
   0x8   :  { %19 = vsyncpa [#allocation4 + $0x1], 0 }
   0x9   :  { %20 = vsyncpa [#allocation10], 0 }
   0xa   :  { %22 = vsyncpa [#allocation10 + $0x1], 0  ;;  %s2065_s24 = smov 0   ;;  %s2067_s25 = smov 0  }
   0xb   :  { %s2069_s26 = smov 0   ;;  %s2071_s27 = smov 0  }
   0xc   :  { %s2073_s28 = smov 0   ;;  %s2075_s29 = smov 0  }
   0xd LB: > { %s2096_s30 = sadd.s32 4294967295, %s2016_s29   ;;  %s2867_s8 = sadd.s32 4294967294, %s2016_s29   ;;  %s2016_s29 = sphi %s2075_s29, %s28_s29   ;;  %s2012_s28 = sphi %s2073_s28, %s2931_s28   ;;  %s2008_s27 = sphi %s2071_s27, %s2930_s27   ;;  %s2004_s26 = sphi %s2069_s26, %s2929_s26   ;;  %s2000_s25 = sphi %s2067_s25, %s2928_s25   ;;  %s1996_s24 = sphi %s2065_s24, %s2927_s24  }
   0xe   : > { %p62_p0 = scmp.ne.s32.totalorder %s2000_s25, %s1996_s24  ;;  %p63_p1 = scmp.eq.s32.totalorder %s2096_s30, 0 }
   0xf   : > { %p157_p2 = scmp.eq.s32.totalorder %s2867_s8, 1  ;;  %p1574_p4 = scmp.ge.s32.totalorder %s2016_s29, 1 }
  0x10   : > { %p2106_p3 = por %p63_p1, %p62_p0  ;;  %p242_p6 = scmp.lt.s32.totalorder %s2016_s29, 3 }
  0x11   : > { %p2111_p5 = por %p157_p2, %p62_p0  ;;  %s2891_s1 = sld [smem:[#allocation30_spill]] }
  0x12   : > { %p2119_p7 = pnand %p1574_p4, %p242_p6  ;;  %s2018_s15 = smov [#allocation5]  }
  0x13   : > { %s2889_s10 = scalar_select %p2111_p5, 1, 0 }
  0x14   : > { %p1697_p8 = pneg %p2119_p7  ;;  %s255_s16 = sshll.u32 %s2018_s15, 4  ;;  %s256_s16 = int_to_ptr.vmem [resolvable:$true] %s255_s16 }
  0x15   : > { %2890 = sst [smem:[#allocation16_spill]] %s2889_s10  ;;  %p1577_p10 = scmp.ge.s32.totalorder %s2016_s29, 2 }
  0x16   : > { %p1698_p9 = pnand %p1697_p8, %p63_p1  ;;  %s2893_s2 = sld [smem:[#allocation31_spill]] }
  0x17   : > { %s253_s13 = sshll.u32 %s2891_s1, 4  ;;  %s2868_s20 = smov 128   ;;  %s254_s13 = int_to_ptr.hbm [resolvable:$true] %s253_s13 }
  0x18   : > { %s2869_s21 = smov 8   ;;  %s2021_s22 = smov [#allocation7]  }
  0x19   : > { %1700 = dma.hbm_to_vmem [thread:$0]  (!%p1698_p9), %s254_s13, 2048, %s256_s16, [#allocation6], %s2868_s20, %s2868_s20, %s2869_s21  }
  0x1a   : > { %s269_s23 = sshll.u32 %s2021_s22, 4  ;;  %p151_p11 = scmp.eq.s32.totalorder %s2096_s30, 1  ;;  %s270_s23 = int_to_ptr.vmem [resolvable:$true] %s269_s23 }
  0x1b   : > { %s40_s11 = sadd.s32 1, %s2012_s28  ;;  %s49_s12 = sadd.s32 1, %s2004_s26 }
  0x1c   : > { %s267_s19 = sshll.u32 %s2893_s2, 4  ;;  %p42_p12 = scmp.ge.s32.totalorder %s40_s11, 2  ;;  %s268_s19 = int_to_ptr.hbm [resolvable:$true] %s267_s19 }
  0x1d   : > { %1703 = dma.hbm_to_vmem [thread:$0]  (!%p1698_p9), %s268_s19, 2048, %s270_s23, [#allocation6], %s2868_s20, %s2868_s20, %s2869_s21  }
  0x1e   : > { %p56_p13 = scmp.ne.s32.totalorder %s2004_s26, %s2000_s25  ;;  %p57_p0 = scmp.eq.s32.totalorder %s2016_s29, 0 }
  0x1f   : > { %s2933_s11 = smov (%p42_p12, %s40_s11), 0  ;;  %p1720_p4 = scmp.lt.s32.totalorder %s2016_s29, 2 }
  0x20   : > { %2894 = sst [smem:[#allocation17_spill]] %s2933_s11  ;;  %p2145_p2 = por %p151_p11, %p56_p13 }
  0x21   : > { %s46_s15 = ssub.s32 %s2012_s28, %s2933_s11  ;;  %s286_s16 = sand.u32 1, %s2004_s26  }
  0x22   : > { %p47_p6 = scmp.eq.s32.totalorder %s46_s15, 0  ;;  %p58_p8 = por %p57_p0, %p56_p13 }
  0x23   : > { %s1578_s17 = sshll.u32 %s286_s16, 7  ;;  %s1628_s18 = sshll.u32 %s2012_s28, 7 }
  0x24   : > { %s2155_s19 = scalar_select %p47_p6, %s2004_s26, %s49_s12  }
  0x25   : > { %s2896_s0 = sld [smem:[#allocation29_spill]]  ;;  %s290_s21 = scalar_lea.vmem [#allocation2], %s1578_s17 }
  0x26   : > { %s299_s1 = sshll.u32 %s290_s21, 4  ;;  %p1705_p9 = pnand %p1720_p4, %p58_p8  ;;  %s300_s1 = int_to_ptr.vmem [resolvable:$true] %s299_s1 }
  0x27   : > { %s287_s2 = scalar_lea.sflag [#allocation3], %s286_s16  ;;  %s2897_s11 = smov 8  }
  0x28   : > { %s2898_s10 = smov 128  }
  0x29   : > { %311 = sbr.rel (%p2119_p7) target bundleno = 1020 (0x3fc), region = 36 }
  0x2b   : > { %s296_s8 = scalar_lea.hbm %s2896_s0, %s1628_s18 }
  0x2c   : > { %s297_s20 = sshll.u32 %s296_s8, 4  ;;  %s298_s20 = int_to_ptr.hbm [resolvable:$true] %s297_s20 }
  0x2d   : > { %1707 = dma.hbm_to_vmem [thread:$0]  (!%p1705_p9), %s298_s20, 2048, %s300_s1, %s287_s2, %s2898_s10, %s2898_s10, %s2897_s11  }
  0x2e   : > { %s2168_s12 = sand.u32 1, %s2000_s25  }
  0x2f   : > { %s2171_s8 = sshll.u32 %s2168_s12, 7  ;;  %s314_s21 = scalar_lea.sflag [#allocation3], %s2168_s12 }
  0x30   : > { %s2175_s15 = scalar_lea.vmem [#allocation2], %s2171_s8 }
  0x31   : > { %1979 = dma.done.wait (%p2106_p3), %s314_s21, 2048  }
  0x32   : > { %1981 = vsyncadd (%p2106_p3), %s314_s21, 4294965248 }
  0x33   : > { %1983 = dma.done.wait (%p63_p1), [#allocation6], 4096  }
  0x34   : > { %1985 = vsyncadd (%p63_p1), [#allocation6], 4294963200  ;;  %v449_v0 = vld [vmem:[#allocation7 + $0x78] sm:$0xff]  ;;  %v448_v1 = vld [vmem:[#allocation7 + $0x70] sm:$0xff]  ;;  %s2582_s9 = scalar_lea.vmem [#allocation9], %s2168_s12  ;;  %s2591_s10 = sshll.u32 %s2008_s27, 7 }
  0x35   : > { %498 = vmatpush.msra.mxu0 %v449_v0  ;;  %1631 = vmatpush.msra.mxu3 %v449_v0  ;;  %v447_v2 = vld [vmem:[#allocation7 + $0x68] sm:$0xff]  ;;  %v446_v3 = vld [vmem:[#allocation7 + $0x60] sm:$0xff]  ;;  %v445_v4 = vld [vmem:[#allocation7 + $0x58] sm:$0xff]  ;;  %s2725_s14 = scalar_lea.vmem [#allocation8], %s2171_s8  ;;  %p375_p1 = scmp.lt.s32.totalorder %s2008_s27, 1 }
  0x36   : > { %v2186_v5 = vld [vmem:[%s2175_s15] sm:$0xff]  ;;  %v444_v6 = vld [vmem:[#allocation7 + $0x50] sm:$0xff]  ;;  %v443_v8 = vld [vmem:[#allocation7 + $0x48] sm:$0xff]  ;;  %s1356_s21 = scalar_lea.hbm %s2863_s4, %s2591_s10  ;;  %s1336_s11 = sand.u32 1, %s2096_s30  }
  0x37   : > { %499 = vmatpush.msra.mxu0 %v448_v1  ;;  %1632 = vmatpush.msra.mxu3 %v448_v1  ;;  %v450_v7 = vmul.f32 %v2186_v5, %v2186_v5  ;;  %v442_v9 = vld [vmem:[#allocation7 + $0x40] sm:$0xff]  ;;  %v441_v10 = vld [vmem:[#allocation7 + $0x38] sm:$0xff]  ;;  %v2191_v11 = vld [vmem:[%s2175_s15 + $0x8] sm:$0xff]  ;;  %s376_s20 = scalar_select %p375_p1, %s2008_s27, 1 }
  0x38   : > { %v440_v12 = vld [vmem:[#allocation7 + $0x30] sm:$0xff]  ;;  %v451_v13 = vmul.f32 %v2191_v11, %v2191_v11  ;;  %v439_v14 = vld [vmem:[#allocation7 + $0x28] sm:$0xff]  ;;  %v438_v15 = vld [vmem:[#allocation7 + $0x20] sm:$0xff]  ;;  %s1373_s16 = sshll.u32 %s2582_s9, 4  ;;  %s2765_s0 = scalar_lea.sflag [#allocation10], %s1336_s11  ;;  %s1374_s16 = int_to_ptr.vmem [resolvable:$true] %s1373_s16 }
  0x39   : > { %500 = vmatpush.msra.mxu0 %v447_v2  ;;  %1633 = vmatpush.msra.mxu3 %v447_v2  ;;  %v437_v16 = vld [vmem:[#allocation7 + $0x18] sm:$0xff]  ;;  %v2196_v17 = vld [vmem:[%s2175_s15 + $0x10] sm:$0xff]  ;;  %v435_v20 = vld [vmem:[#allocation7 + $0x8] sm:$0xff]  ;;  %s377_s17 = scalar_lea.vmem %s2866_s7, %s376_s20  ;;  %s1371_s20 = scalar_lea.hbm %s2864_s5, %s2008_s27 }
  0x3a   : > { %466 = vadd.xlane.f32.xlu0 %v450_v7  ;;  %v436_v18 = vld [vmem:[#allocation7 + $0x10] sm:$0xff]  ;;  %v452_v19 = vmul.f32 %v2196_v17, %v2196_v17  ;;  %v434_v21 = vld [vmem:[#allocation7] sm:$0xff]  ;;  %v2201_v22 = vld [vmem:[%s2175_s15 + $0x18] sm:$0xff]  ;;  %s1890_s1 = scalar_lea.hbm %s2864_s5, 2 }
  0x3b   : > { %501 = vmatpush.msra.mxu0 %v446_v3  ;;  %1634 = vmatpush.msra.mxu3 %v446_v3  ;;  %v453_v23 = vmul.f32 %v2201_v22, %v2201_v22  ;;  %v2207_v24 = vld [vmem:[%s2175_s15 + $0x20] sm:$0xff]  ;;  %v2213_v26 = vld [vmem:[%s2175_s15 + $0x30] sm:$0xff]  ;;  %v2216_v27 = vld [vmem:[%s2175_s15 + $0x28] sm:$0xff] }
  0x3c   : > { %470 = vadd.xlane.f32.xlu1 %v452_v19  ;;  %v454_v25 = vmul.f32 %v2207_v24, %v2207_v24  ;;  %v2220_v28 = vld [vmem:[%s2175_s15 + $0x60] sm:$0xff]  ;;  %v455_v29 = vmul.f32 %v2216_v27, %v2216_v27  ;;  %v456_v30 = vmul.f32 %v2213_v26, %v2213_v26  ;;  %v2228_v31 = vld [vmem:[%s2175_s15 + $0x48] sm:$0xff]  ;;  %v2238_v34 = vld [vmem:[%s2175_s15 + $0x38] sm:$0xff] }
  0x3d   : > { %502 = vmatpush.msra.mxu0 %v445_v4  ;;  %1635 = vmatpush.msra.mxu3 %v445_v4  ;;  %v2232_v32 = vld [vmem:[%s2175_s15 + $0x68] sm:$0xff]  ;;  %v459_v33 = vmul.f32 %v2228_v31, %v2228_v31  ;;  %v2242_v35 = vld [vmem:[%s2175_s15 + $0x70] sm:$0xff]  ;;  %v457_v36 = vmul.f32 %v2238_v34, %v2238_v34  ;;  %v462_v37 = vmul.f32 %v2220_v28, %v2220_v28  ;;  %v2250_v38 = vld [vmem:[%s2175_s15 + $0x40] sm:$0xff] }
  0x3e   : > { %474 = vadd.xlane.f32.xlu2 %v454_v25  ;;  %v2253_v39 = vld [vmem:[%s2175_s15 + $0x50] sm:$0xff]  ;;  %v2257_v40 = vld [vmem:[%s2175_s15 + $0x78] sm:$0xff]  ;;  %v458_v41 = vmul.f32 %v2250_v38, %v2250_v38  ;;  %v463_v43 = vmul.f32 %v2232_v32, %v2232_v32  ;;  %v464_v47 = vmul.f32 %v2242_v35, %v2242_v35  ;;  %v2300_v49 = vld [vmem:[%s2862_s3] ss:$0 sm:$0xff] }
  0x3f   : > { %503 = vmatpush.msra.mxu0 %v444_v6  ;;  %1636 = vmatpush.msra.mxu3 %v444_v6  ;;  %v460_v42 = vmul.f32 %v2253_v39, %v2253_v39  ;;  %v2272_v44 = vld [vmem:[%s2175_s15 + $0x58] sm:$0xff]  ;;  %v465_v45 = vmul.f32 %v2257_v40, %v2257_v40  ;;  %s2755_s15 = sshll.u32 %s1356_s21, 4 }
  0x40   : > { %1173 = vmatpush.msra.mxu2 %v2257_v40  ;;  %v461_v46 = vmul.f32 %v2272_v44, %v2272_v44  ;;  %2920 = sst [smem:[#allocation28_spill]] %s2755_s15 }
  0x41   : > { %504 = vmatpush.msra.mxu0 %v443_v8  ;;  %1637 = vmatpush.msra.mxu3 %v443_v8 }
  0x42   : > { %468 = vadd.xlane.f32.xlu0 %v451_v13  ;;  %1174 = vmatpush.msra.mxu2 %v2242_v35 }
  0x43   : > { %505 = vmatpush.msra.mxu0 %v442_v9  ;;  %1638 = vmatpush.msra.mxu3 %v442_v9 }
  0x44   : > { %472 = vadd.xlane.f32.xlu1 %v453_v23  ;;  %1175 = vmatpush.msra.mxu2 %v2232_v32 }
  0x45   : > { %506 = vmatpush.msra.mxu0 %v441_v10  ;;  %1639 = vmatpush.msra.mxu3 %v441_v10 }
  0x46   : > { %476 = vadd.xlane.f32.xlu2 %v455_v29  ;;  %1176 = vmatpush.msra.mxu2 %v2220_v28 }
  0x47   : > { %507 = vmatpush.msra.mxu0 %v440_v12  ;;  %1640 = vmatpush.msra.mxu3 %v440_v12 }
  0x48   : > { %1177 = vmatpush.msra.mxu2 %v2272_v44 }
  0x49   : > { %508 = vmatpush.msra.mxu0 %v439_v14  ;;  %1641 = vmatpush.msra.mxu3 %v439_v14 }
  0x4a   : > { %478 = vadd.xlane.f32.xlu0 %v456_v30  ;;  %1178 = vmatpush.msra.mxu2 %v2253_v39 }
  0x4b   : > { %509 = vmatpush.msra.mxu0 %v438_v15  ;;  %1642 = vmatpush.msra.mxu3 %v438_v15 }
  0x4c   : > { %480 = vadd.xlane.f32.xlu1 %v457_v36  ;;  %1179 = vmatpush.msra.mxu2 %v2228_v31 }
  0x4d   : > { %510 = vmatpush.msra.mxu0 %v437_v16  ;;  %1643 = vmatpush.msra.mxu3 %v437_v16 }
  0x4e   : > { %482 = vadd.xlane.f32.xlu2 %v458_v41  ;;  %1180 = vmatpush.msra.mxu2 %v2250_v38 }
  0x4f   : > { %511 = vmatpush.msra.mxu0 %v436_v18  ;;  %1644 = vmatpush.msra.mxu3 %v436_v18 }
  0x50   : > { %1181 = vmatpush.msra.mxu2 %v2238_v34 }
  0x51   : > { %512 = vmatpush.msra.mxu0 %v435_v20  ;;  %1645 = vmatpush.msra.mxu3 %v435_v20 }
  0x52   : > { %484 = vadd.xlane.f32.xlu0 %v459_v33  ;;  %1182 = vmatpush.msra.mxu2 %v2213_v26 }
  0x53   : > { %513 = vmatpush.msra.mxu0 %v434_v21  ;;  %1646 = vmatpush.msra.mxu3 %v434_v21 }
  0x54   : > { %514 = vmatmul.f32.vlgmr.msra.gmra.mxu0 %v2186_v5  ;;  %550 = vmatmul.f32.vlgmr.msra.gmra.mxu3 %v2220_v28 }
  0x55   : > { %486 = vadd.xlane.f32.xlu1 %v460_v42  ;;  %1183 = vmatpush.msra.mxu2 %v2216_v27 }
  0x56   : > { %488 = vadd.xlane.f32.xlu2 %v461_v46 }
  0x57   : > { %1184 = vmatpush.msra.mxu2 %v2207_v24 }
  0x59   : > { %1185 = vmatpush.msra.mxu2 %v2201_v22 }
  0x5a   : > { %490 = vadd.xlane.f32.xlu0 %v462_v37 }
  0x5b   : > { %1186 = vmatpush.msra.mxu2 %v2196_v17 }
  0x5c   : > { %517 = vmatmul.f32.gmra.mxu0 %v2191_v11  ;;  %553 = vmatmul.f32.gmra.mxu3 %v2232_v32 }
  0x5d   : > { %492 = vadd.xlane.f32.xlu1 %v463_v43  ;;  %1187 = vmatpush.msra.mxu2 %v2191_v11 }
  0x5e   : > { %494 = vadd.xlane.f32.xlu2 %v464_v47 }
  0x5f   : > { %1188 = vmatpush.msra.mxu2 %v2186_v5 }
  0x64   : > { %520 = vmatmul.f32.gmra.mxu0 %v2196_v17  ;;  %556 = vmatmul.f32.gmra.mxu3 %v2242_v35 }
  0x65   : > { %496 = vadd.xlane.f32.xlu1 %v465_v45 }
  0x6c   : > { %523 = vmatmul.f32.gmra.mxu0 %v2201_v22  ;;  %559 = vmatmul.f32.gmra.mxu3 %v2257_v40 }
  0x74   : > { %526 = vmatmul.f32.gmra.mxu0 %v2207_v24 }
  0x7c   : > { %529 = vmatmul.f32.gmra.mxu0 %v2216_v27 }
  0x84   : > { %532 = vmatmul.f32.gmra.mxu0 %v2213_v26 }
  0x8c   : > { %535 = vmatmul.f32.gmra.mxu0 %v2238_v34 }
  0x94   : > { %538 = vmatmul.f32.gmra.mxu0 %v2250_v38 }
  0x9c   : > { %541 = vmatmul.f32.gmra.mxu0 %v2228_v31 }
  0xa4   : > { %544 = vmatmul.f32.gmra.mxu0 %v2253_v39 }
  0xac   : > { %547 = vmatmul.f32.gmra.mxu0 %v2272_v44 }
  0xad   : > { %v467_v48 = vpop.xlane.xlu0 %466 }
  0xae   : > { %v566_v50 = vadd.f32 %v2300_v49, %v467_v48 }
  0xaf   : > { %v471_v58 = vpop.xlane.xlu1 %470 }
  0xb0   : > { %v568_v60 = vadd.f32 %v2300_v49, %v471_v58 }
  0xb1   : > { %v475_v4 = vpop.xlane.xlu2 %474 }
  0xb2   : > { %v570_v8 = vadd.f32 %v2300_v49, %v475_v4 }
  0xb5   : > { %v469_v54 = vpop.xlane.xlu0 %468 }
  0xb6   : > { %v567_v55 = vadd.f32 %v2300_v49, %v469_v54 }
  0xb7   : > { %v473_v0 = vpop.xlane.xlu1 %472 }
  0xb8   : > { %v569_v1 = vadd.f32 %v2300_v49, %v473_v0 }
  0xb9   : > { %v477_v13 = vpop.xlane.xlu2 %476 }
  0xba   : > { %v571_v14 = vadd.f32 %v2300_v49, %v477_v13 }
  0xbd   : > { %v479_v7 = vpop.xlane.xlu0 %478 }
  0xbe   : > { %v572_v23 = vadd.f32 %v2300_v49, %v479_v7 }
  0xbf   : > { %v481_v21 = vpop.xlane.xlu1 %480 }
  0xc0   : > { %v573_v43 = vadd.f32 %v2300_v49, %v481_v21 }
  0xc5   : > { %v485_v16 = vpop.xlane.xlu0 %484 }
  0xc6   : > { %v575_v58 = vadd.f32 %v2300_v49, %v485_v16 }
  0xc8   : > { %v487_v42 = vpop.xlane.xlu1 %486 }
  0xc9   : > { %v576_v4 = vadd.f32 %v2300_v49, %v487_v42 }
  0xcd   : > { %v491_v30 = vpop.xlane.xlu0 %490 }
  0xce   : > { %v578_v37 = vadd.f32 %v2300_v49, %v491_v30 }
  0xd1   : > { %v515_v51 = vpop.f32.mrf.mxu0 }
  0xd2   : > { %v582_v52 = vmul.f32 2.0, %v515_v51 }
  0xd4   : > { %v2303_v53 = vsub.f32 %v566_v50, %v582_v52  ;;  %v483_v50 = vpop.xlane.xlu2 %482 }
  0xd5   : > { %v574_v51 = vadd.f32 %v2300_v49, %v483_v50 }
  0xd6   : > { %614 = vmin.xlane.f32.xlu0 %v2303_v53 }
  0xd7   : > { %v551_v20 = vpop.f32.mrf.mxu3 }
  0xd8   : > { %v594_v36 = vmul.f32 2.0, %v551_v20 }
  0xd9   : > { %v518_v56 = vpop.f32.mrf.mxu0 }
  0xda   : > { %v583_v57 = vmul.f32 2.0, %v518_v56  ;;  %v2332_v47 = vsub.f32 %v578_v37, %v594_v36  ;;  %v2872_v37 = vlaneseq }
  0xdc   : > { %v2307_v59 = vsub.f32 %v567_v55, %v583_v57  ;;  %2900 = vst [vmem:[#allocation19_spill] sm:$0xff] %v2332_v47  ;;  %v493_v55 = vpop.xlane.xlu1 %492 }
  0xde   : > { %616 = vmin.xlane.f32.xlu2 %v2307_v59 }
  0xdf   : > { %v554_v41 = vpop.f32.mrf.mxu3 }
  0xe1   : > { %v521_v61 = vpop.f32.mrf.mxu0 }
  0xe2   : > { %v584_v62 = vmul.f32 2.0, %v521_v61 }
  0xe4   : > { %v2311_v63 = vsub.f32 %v568_v60, %v584_v62  ;;  %v497_v0 = vpop.xlane.xlu1 %496 }
  0xe6   : > { %618 = vmin.xlane.f32.xlu0 %v2311_v63 }
  0xe7   : > { %v557_v52 = vpop.f32.mrf.mxu3 }
  0xe9   : > { %v524_v2 = vpop.f32.mrf.mxu0 }
  0xea   : > { %v585_v3 = vmul.f32 2.0, %v524_v2 }
  0xec   : > { %v2315_v6 = vsub.f32 %v569_v1, %v585_v3  ;;  %v581_v3 = vadd.f32 %v2300_v49, %v497_v0 }
  0xee   : > { %620 = vmin.xlane.f32.xlu1 %v2315_v6 }
  0xef   : > { %v560_v62 = vpop.f32.mrf.mxu3 }
  0xf0   : > { %v597_v2 = vmul.f32 2.0, %v560_v62 }
  0xf1   : > { %v527_v9 = vpop.f32.mrf.mxu0 }
  0xf2   : > { %v586_v10 = vmul.f32 2.0, %v527_v9  ;;  %v2348_v9 = vsub.f32 %v581_v3, %v597_v2 }
  0xf4   : > { %v2319_v12 = vsub.f32 %v570_v8, %v586_v10  ;;  %v489_v8 = vpop.xlane.xlu2 %488  ;;  %2904 = vst [vmem:[#allocation23_spill] sm:$0xff] %v2348_v9 }
  0xf5   : > { %v577_v16 = vadd.f32 %v2300_v49, %v489_v8 }
  0xf6   : > { %622 = vmin.xlane.f32.xlu2 %v2319_v12 }
  0xf9   : > { %v530_v15 = vpop.f32.mrf.mxu0 }
  0xfa   : > { %v587_v18 = vmul.f32 2.0, %v530_v15  ;;  %v579_v15 = vadd.f32 %v2300_v49, %v493_v55 }
  0xfc   : > { %v2323_v19 = vsub.f32 %v571_v14, %v587_v18  ;;  %v595_v14 = vmul.f32 2.0, %v554_v41  ;;  %v2367_v41 = vand.u32 127, %v2872_v37 }
  0xfe   : > { %624 = vmin.xlane.f32.xlu0 %v2323_v19  ;;  %v2356_v20 = vsub.f32 %v579_v15, %v595_v14 }
 0x100   : > { %2906 = vst [vmem:[#allocation25_spill] sm:$0xff] %v2356_v20 }
 0x101   : > { %v533_v25 = vpop.f32.mrf.mxu0 }
 0x102   : > { %v588_v29 = vmul.f32 2.0, %v533_v25 }
 0x104   : > { %v2327_v33 = vsub.f32 %v572_v23, %v588_v29  ;;  %v495_v23 = vpop.xlane.xlu2 %494  ;;  %v596_v29 = vmul.f32 2.0, %v557_v52 }
 0x105   : > { %v580_v30 = vadd.f32 %v2300_v49, %v495_v23 }
 0x106   : > { %2899 = vst [vmem:[#allocation18_spill] sm:$0xff] %v2327_v33  ;;  %626 = vmin.xlane.f32.xlu1 %v2327_v33 }
 0x107   : > { %v2363_v36 = vsub.f32 %v580_v30, %v596_v29 }
 0x109   : > { %v536_v45 = vpop.f32.mrf.mxu0  ;;  %2908 = vst [vmem:[#allocation27_spill] sm:$0xff] %v2363_v36 }
 0x10a   : > { %v589_v46 = vmul.f32 2.0, %v536_v45 }
 0x10c   : > { %v2334_v48 = vsub.f32 %v573_v43, %v589_v46 }
 0x10e   : > { %2901 = vst [vmem:[#allocation20_spill] sm:$0xff] %v2334_v48  ;;  %628 = vmin.xlane.f32.xlu2 %v2334_v48  ;;  %638 = vmin.xlane.f32.xlu1 %v2332_v47 }
 0x111   : > { %v539_v54 = vpop.f32.mrf.mxu0 }
 0x112   : > { %v590_v56 = vmul.f32 2.0, %v539_v54 }
 0x114   : > { %v2339_v57 = vsub.f32 %v574_v51, %v590_v56 }
 0x116   : > { %2902 = vst [vmem:[#allocation21_spill] sm:$0xff] %v2339_v57  ;;  %630 = vmin.xlane.f32.xlu0 %v2339_v57 }
 0x119   : > { %v542_v60 = vpop.f32.mrf.mxu0 }
 0x11a   : > { %v591_v61 = vmul.f32 2.0, %v542_v60 }
 0x11c   : > { %v2343_v1 = vsub.f32 %v575_v58, %v591_v61 }
 0x11e   : > { %2903 = vst [vmem:[#allocation22_spill] sm:$0xff] %v2343_v1  ;;  %632 = vmin.xlane.f32.xlu1 %v2343_v1 }
 0x121   : > { %v545_v7 = vpop.f32.mrf.mxu0 }
 0x122   : > { %v592_v10 = vmul.f32 2.0, %v545_v7 }
 0x124   : > { %v2350_v13 = vsub.f32 %v576_v4, %v592_v10 }
 0x126   : > { %2905 = vst [vmem:[#allocation24_spill] sm:$0xff] %v2350_v13  ;;  %634 = vmin.xlane.f32.xlu2 %v2350_v13  ;;  %644 = vmin.xlane.f32.xlu1 %v2348_v9 }
 0x129   : > { %v548_v18 = vpop.f32.mrf.mxu0 }
 0x12a   : > { %v593_v21 = vmul.f32 2.0, %v548_v18 }
 0x12c   : > { %v2358_v25 = vsub.f32 %v577_v16, %v593_v21 }
 0x12e   : > { %2907 = vst [vmem:[#allocation26_spill] sm:$0xff] %v2358_v25  ;;  %636 = vmin.xlane.f32.xlu0 %v2358_v25  ;;  %640 = vmin.xlane.f32.xlu2 %v2356_v20 }
 0x136   : > { %642 = vmin.xlane.f32.xlu0 %v2363_v36 }
 0x149   : > { %v615_v42 = vpop.xlane.xlu0 %614 }
 0x14a   : > { %vm648_vm0 = vcmp.eq.f32.partialorder %v2303_v53, %v615_v42 }
 0x14b   : > { %v2371_v43 = vsel %vm648_vm0, %v2367_v41, 128 }
 0x14c   : > { %v681_v45 = vshra.s32 %v2371_v43, 16 }
 0x14e   : > { %v2374_v46 = vcvt.s32.f32 %v681_v45 }
 0x150   : > { %684 = vmin.xlane.f32.xlu2 %v2374_v46 }
 0x151   : > { %v617_v49 = vpop.xlane.xlu2 %616 }
 0x152   : > { %vm649_vm1 = vcmp.eq.f32.partialorder %v2307_v59, %v617_v49 }
 0x153   : > { %v2379_v50 = vsel %vm649_vm1, %v2367_v41, 128 }
 0x154   : > { %v695_v51 = vshra.s32 %v2379_v50, 16 }
 0x156   : > { %v2382_v52 = vcvt.s32.f32 %v695_v51 }
 0x158   : > { %698 = vmin.xlane.f32.xlu0 %v2382_v52 }
 0x159   : > { %v619_v54 = vpop.xlane.xlu0 %618 }
 0x15a   : > { %vm650_vm2 = vcmp.eq.f32.partialorder %v2311_v63, %v619_v54 }
 0x15b   : > { %v2387_v55 = vsel %vm650_vm2, %v2367_v41, 128 }
 0x15c   : > { %v709_v56 = vshra.s32 %v2387_v55, 16 }
 0x15e   : > { %v2390_v58 = vcvt.s32.f32 %v709_v56 }
 0x160   : > { %712 = vmin.xlane.f32.xlu1 %v2390_v58 }
 0x161   : > { %v621_v60 = vpop.xlane.xlu1 %620 }
 0x162   : > { %vm651_vm3 = vcmp.eq.f32.partialorder %v2315_v6, %v621_v60 }
 0x163   : > { %v2395_v61 = vsel %vm651_vm3, %v2367_v41, 128 }
 0x164   : > { %v723_v62 = vshra.s32 %v2395_v61, 16 }
 0x166   : > { %v2398_v0 = vcvt.s32.f32 %v723_v62 }
 0x168   : > { %726 = vmin.xlane.f32.xlu2 %v2398_v0 }
 0x169   : > { %v623_v2 = vpop.xlane.xlu2 %622 }
 0x16a   : > { %vm652_vm4 = vcmp.eq.f32.partialorder %v2319_v12, %v623_v2 }
 0x16b   : > { %v2403_v3 = vsel %vm652_vm4, %v2367_v41, 128 }
 0x16c   : > { %v737_v4 = vshra.s32 %v2403_v3, 16 }
 0x16e   : > { %v2406_v7 = vcvt.s32.f32 %v737_v4 }
 0x170   : > { %740 = vmin.xlane.f32.xlu0 %v2406_v7 }
 0x171   : > { %v625_v8 = vpop.xlane.xlu0 %624 }
 0x172   : > { %vm653_vm5 = vcmp.eq.f32.partialorder %v2323_v19, %v625_v8 }
 0x173   : > { %v2411_v10 = vsel %vm653_vm5, %v2367_v41, 128 }
 0x174   : > { %v751_v14 = vshra.s32 %v2411_v10, 16 }
 0x176   : > { %v2414_v15 = vcvt.s32.f32 %v751_v14 }
 0x178   : > { %754 = vmin.xlane.f32.xlu1 %v2414_v15 }
 0x179   : > { %v627_v16 = vpop.xlane.xlu1 %626 }
 0x17a   : > { %vm654_vm6 = vcmp.eq.f32.partialorder %v2327_v33, %v627_v16 }
 0x17b   : > { %v2419_v18 = vsel %vm654_vm6, %v2367_v41, 128 }
 0x17c   : > { %v765_v21 = vshra.s32 %v2419_v18, 16 }
 0x17e   : > { %v2422_v23 = vcvt.s32.f32 %v765_v21 }
 0x180   : > { %768 = vmin.xlane.f32.xlu2 %v2422_v23 }
 0x181   : > { %v629_v29 = vpop.xlane.xlu2 %628  ;;  %v639_v49 = vpop.xlane.xlu1 %638 }
 0x182   : > { %vm655_vm7 = vcmp.eq.f32.partialorder %v2334_v48, %v629_v29  ;;  %vm660_vm10 = vcmp.eq.f32.partialorder %v2332_v47, %v639_v49 }
 0x183   : > { %v2427_v30 = vsel %vm655_vm7, %v2367_v41, 128  ;;  %v2450_v14 = vsel %vm660_vm10, %v2367_v41, 128 }
 0x184   : > { %v779_v42 = vshra.s32 %v2427_v30, 16  ;;  %v849_v29 = vshra.s32 %v2450_v14, 16 }
 0x186   : > { %v2430_v45 = vcvt.s32.f32 %v779_v42 }
 0x188   : > { %782 = vmin.xlane.f32.xlu0 %v2430_v45 }
 0x189   : > { %v631_v51 = vpop.xlane.xlu0 %630 }
 0x18a   : > { %vm656_vm8 = vcmp.eq.f32.partialorder %v2339_v57, %v631_v51 }
 0x18b   : > { %v2435_v54 = vsel %vm656_vm8, %v2367_v41, 128 }
 0x18c   : > { %v793_v56 = vshra.s32 %v2435_v54, 16 }
 0x18e   : > { %v2438_v60 = vcvt.s32.f32 %v793_v56 }
 0x190   : > { %796 = vmin.xlane.f32.xlu1 %v2438_v60 }
 0x191   : > { %v633_v62 = vpop.xlane.xlu1 %632 }
 0x192   : > { %vm657_vm9 = vcmp.eq.f32.partialorder %v2343_v1, %v633_v62 }
 0x193   : > { %v2443_v2 = vsel %vm657_vm9, %v2367_v41, 128 }
 0x194   : > { %v807_v4 = vshra.s32 %v2443_v2, 16 }
 0x196   : > { %v2447_v8 = vcvt.s32.f32 %v807_v4  ;;  %v2466_v4 = vcvt.s32.f32 %v849_v29 }
 0x198   : > { %810 = vmin.xlane.f32.xlu2 %v2447_v8 }
 0x199   : > { %v635_v16 = vpop.xlane.xlu2 %634  ;;  %v645_v21 = vpop.xlane.xlu1 %644 }
 0x19a   : > { %vm658_vm11 = vcmp.eq.f32.partialorder %v2350_v13, %v635_v16  ;;  %vm663_vm12 = vcmp.eq.f32.partialorder %v2348_v9, %v645_v21 }
 0x19b   : > { %v2457_v42 = vsel %vm658_vm11, %v2367_v41, 128  ;;  %v2460_v49 = vsel %vm663_vm12, %v2367_v41, 128 }
 0x19c   : > { %v821_v51 = vshra.s32 %v2457_v42, 16  ;;  %v891_v56 = vshra.s32 %v2460_v49, 16 }
 0x19e   : > { %v2464_v62 = vcvt.s32.f32 %v821_v51  ;;  %v2468_v37 = vcvt.s32.f32 %v891_v56 }
 0x1a0   : > { %824 = vmin.xlane.f32.xlu0 %v2464_v62  ;;  %852 = vmin.xlane.f32.xlu2 %v2466_v4 }
 0x1a1   : > { %894 = vmin.xlane.f32.xlu1 %v2468_v37  ;;  %v641_v16 = vpop.xlane.xlu2 %640  ;;  %v637_v21 = vpop.xlane.xlu0 %636 }
 0x1a2   : > { %vm661_vm13 = vcmp.eq.f32.partialorder %v2356_v20, %v641_v16  ;;  %vm659_vm14 = vcmp.eq.f32.partialorder %v2358_v25, %v637_v21 }
 0x1a3   : > { %v2476_v9 = vsel %vm661_vm13, %v2367_v41, 128  ;;  %v2479_v29 = vsel %vm659_vm14, %v2367_v41, 128 }
 0x1a4   : > { %v863_v51 = vshra.s32 %v2476_v9, 16  ;;  %v835_v56 = vshra.s32 %v2479_v29, 16 }
 0x1a6   : > { %v2483_v47 = vcvt.s32.f32 %v863_v51  ;;  %v2485_v13 = vcvt.s32.f32 %v835_v56  ;;  %v680_v51 = vand.u32 65535, %v2371_v43  ;;  %v708_v43 = vand.u32 65535, %v2387_v55 }
 0x1a8   : > { %866 = vmin.xlane.f32.xlu0 %v2483_v47  ;;  %v682_v1 = vcvt.s32.f32 %v680_v51  ;;  %v710_v51 = vcvt.s32.f32 %v708_v43 }
 0x1a9   : > { %838 = vmin.xlane.f32.xlu1 %v2485_v13  ;;  %v643_v16 = vpop.xlane.xlu0 %642 }
 0x1aa   : > { %vm662_vm15 = vcmp.eq.f32.partialorder %v2363_v36, %v643_v16  ;;  %v694_v16 = vand.u32 65535, %v2379_v50 }
 0x1ab   : > { %v2491_v21 = vsel %vm662_vm15, %v2367_v41, 128 }
 0x1ac   : > { %v877_v20 = vshra.s32 %v2491_v21, 16  ;;  %v696_v48 = vcvt.s32.f32 %v694_v16 }
 0x1ae   : > { %v2494_v25 = vcvt.s32.f32 %v877_v20 }
 0x1b0   : > { %880 = vmin.xlane.f32.xlu2 %v2494_v25 }
 0x1c3   : > { %v2498_v56 = vpop.xlane.xlu2 %684 }
 0x1c4   : > { %vm686_vm0 = vcmp.eq.f32.partialorder %v2374_v46, %v2498_v56 }
 0x1c5   : > { %v687_v57 = vsel %vm686_vm0, %v682_v1, inf }
 0x1c6   : > { %688 = vmin.xlane.f32.xlu1 %v687_v57  ;;  %v722_v57 = vand.u32 65535, %v2395_v61  ;;  %v750_v61 = vand.u32 65535, %v2411_v10  ;;  %v778_v10 = vand.u32 65535, %v2427_v30 }
 0x1c8   : > { %v724_v50 = vcvt.s32.f32 %v722_v57  ;;  %v752_v43 = vcvt.s32.f32 %v750_v61  ;;  %v430_v61 = vld [vmem:[#allocation5 + $0x60] sm:$0xff] }
 0x1cb   : > { %v2503_v36 = vpop.xlane.xlu0 %698 }
 0x1cc   : > { %vm700_vm1 = vcmp.eq.f32.partialorder %v2382_v52, %v2503_v36  ;;  %v736_v52 = vand.u32 65535, %v2403_v3  ;;  %v764_v3 = vand.u32 65535, %v2419_v18  ;;  %v792_v18 = vand.u32 65535, %v2435_v54  ;;  %v429_v54 = vld [vmem:[#allocation5 + $0x58] sm:$0xff] }
 0x1cd   : > { %v701_v20 = vsel %vm700_vm1, %v696_v48, inf }
 0x1ce   : > { %702 = vmin.xlane.f32.xlu0 %v701_v20  ;;  %v738_v16 = vcvt.s32.f32 %v736_v52  ;;  %v432_v52 = vld [vmem:[#allocation5 + $0x70] sm:$0xff] }
 0x1d3   : > { %v2508_v33 = vpop.xlane.xlu1 %712 }
 0x1d4   : > { %vm714_vm2 = vcmp.eq.f32.partialorder %v2390_v58, %v2508_v33 }
 0x1d5   : > { %v715_v1 = vsel %vm714_vm2, %v710_v51, inf }
 0x1d6   : > { %716 = vmin.xlane.f32.xlu2 %v715_v1  ;;  %v766_v1 = vcvt.s32.f32 %v764_v3 }
 0x1db   : > { %v2513_v46 = vpop.xlane.xlu2 %726 }
 0x1dc   : > { %vm728_vm3 = vcmp.eq.f32.partialorder %v2398_v0, %v2513_v46 }
 0x1dd   : > { %v729_v48 = vsel %vm728_vm3, %v724_v50, inf  ;;  %v780_v50 = vcvt.s32.f32 %v778_v10  ;;  %v820_v10 = vand.u32 65535, %v2457_v42 }
 0x1de   : > { %730 = vmin.xlane.f32.xlu0 %v729_v48  ;;  %v433_v48 = vld [vmem:[#allocation5 + $0x78] sm:$0xff] }
 0x1df   : > { %1020 = vmatpush.msra.mxu1 %v433_v48  ;;  %1647 = vmatpush.msrb.mxu3 %v433_v48 }
 0x1e1   : > { %1021 = vmatpush.msra.mxu1 %v432_v52  ;;  %1648 = vmatpush.msrb.mxu3 %v432_v52  ;;  %v822_v52 = vcvt.s32.f32 %v820_v10  ;;  %v876_v10 = vand.u32 65535, %v2491_v21  ;;  %v2022_v21 = vmov 0.0  }
 0x1e2   : > { %382 = vst [vmem:[%s2582_s9] sm:$0x1] %v2022_v21 }
 0x1e3   : > { %v2518_v55 = vpop.xlane.xlu0 %740 }
 0x1e4   : > { %vm742_vm4 = vcmp.eq.f32.partialorder %v2406_v7, %v2518_v55 }
 0x1e5   : > { %v743_v58 = vsel %vm742_vm4, %v738_v16, inf  ;;  %v794_v16 = vcvt.s32.f32 %v792_v18 }
 0x1e6   : > { %744 = vmin.xlane.f32.xlu1 %v743_v58  ;;  %v431_v58 = vld [vmem:[#allocation5 + $0x68] sm:$0xff] }
 0x1e7   : > { %1022 = vmatpush.msra.mxu1 %v431_v58  ;;  %1649 = vmatpush.msrb.mxu3 %v431_v58  ;;  %v422_v58 = vld [vmem:[#allocation5 + $0x20] sm:$0xff] }
 0x1e9   : > { %1023 = vmatpush.msra.mxu1 %v430_v61  ;;  %1650 = vmatpush.msrb.mxu3 %v430_v61  ;;  %v862_v61 = vand.u32 65535, %v2476_v9 }
 0x1eb   : > { %v2523_v20 = vpop.xlane.xlu1 %754  ;;  %1024 = vmatpush.msra.mxu1 %v429_v54  ;;  %1651 = vmatpush.msrb.mxu3 %v429_v54  ;;  %v834_v54 = vand.u32 65535, %v2479_v29  ;;  %v419_v29 = vld [vmem:[#allocation5 + $0x8] sm:$0xff] }
 0x1ec   : > { %vm756_vm5 = vcmp.eq.f32.partialorder %v2414_v15, %v2523_v20 }
 0x1ed   : > { %v757_v0 = vsel %vm756_vm5, %v752_v43, inf  ;;  %v428_v43 = vld [vmem:[#allocation5 + $0x50] sm:$0xff]  ;;  %v836_v9 = vcvt.s32.f32 %v834_v54 }
 0x1ee   : > { %758 = vmin.xlane.f32.xlu2 %v757_v0  ;;  %1025 = vmatpush.msra.mxu1 %v428_v43 }
 0x1ef   : > { %1652 = vmatpush.msrb.mxu3 %v428_v43 }
 0x1f3   : > { %v2528_v51 = vpop.xlane.xlu2 %768 }
 0x1f4   : > { %vm770_vm6 = vcmp.eq.f32.partialorder %v2422_v23, %v2528_v51 }
 0x1f5   : > { %v771_v7 = vsel %vm770_vm6, %v766_v1, inf  ;;  %v427_v1 = vld [vmem:[#allocation5 + $0x48] sm:$0xff] }
 0x1f6   : > { %772 = vmin.xlane.f32.xlu0 %v771_v7  ;;  %v426_v7 = vld [vmem:[#allocation5 + $0x40] sm:$0xff]  ;;  %1026 = vmatpush.msra.mxu1 %v427_v1 }
 0x1f7   : > { %1653 = vmatpush.msrb.mxu3 %v427_v1  ;;  %v420_v1 = vld [vmem:[#allocation5 + $0x10] sm:$0xff] }
 0x1f8   : > { %1027 = vmatpush.msra.mxu1 %v426_v7 }
 0x1f9   : > { %1654 = vmatpush.msrb.mxu3 %v426_v7 }
 0x1fb   : > { %v2533_v57 = vpop.xlane.xlu0 %782 }
 0x1fc   : > { %vm784_vm7 = vcmp.eq.f32.partialorder %v2430_v45, %v2533_v57  ;;  %v806_v45 = vand.u32 65535, %v2443_v2  ;;  %v848_v2 = vand.u32 65535, %v2450_v14  ;;  %v423_v14 = vld [vmem:[#allocation5 + $0x28] sm:$0xff] }
 0x1fd   : > { %v785_v15 = vsel %vm784_vm7, %v780_v50, inf  ;;  %v425_v50 = vld [vmem:[#allocation5 + $0x38] sm:$0xff] }
 0x1fe   : > { %786 = vmin.xlane.f32.xlu1 %v785_v15  ;;  %v808_v3 = vcvt.s32.f32 %v806_v45  ;;  %v424_v15 = vld [vmem:[#allocation5 + $0x30] sm:$0xff]  ;;  %1028 = vmatpush.msra.mxu1 %v425_v50  ;;  %v890_v45 = vand.u32 65535, %v2460_v49 }
 0x1ff   : > { %1655 = vmatpush.msrb.mxu3 %v425_v50 }
 0x200   : > { %1029 = vmatpush.msra.mxu1 %v424_v15  ;;  %v892_v43 = vcvt.s32.f32 %v890_v45 }
 0x201   : > { %1656 = vmatpush.msrb.mxu3 %v424_v15 }
 0x202   : > { %1030 = vmatpush.msra.mxu1 %v423_v14 }
 0x203   : > { %v2538_v23 = vpop.xlane.xlu1 %796  ;;  %1657 = vmatpush.msrb.mxu3 %v423_v14 }
 0x204   : > { %vm798_vm8 = vcmp.eq.f32.partialorder %v2438_v60, %v2538_v23  ;;  %1031 = vmatpush.msra.mxu1 %v422_v58 }
 0x205   : > { %v799_v30 = vsel %vm798_vm8, %v794_v16, inf  ;;  %1658 = vmatpush.msrb.mxu3 %v422_v58 }
 0x206   : > { %800 = vmin.xlane.f32.xlu2 %v799_v30 }
 0x20b   : > { %v2543_v0 = vpop.xlane.xlu2 %810 }
 0x20c   : > { %vm812_vm9 = vcmp.eq.f32.partialorder %v2447_v8, %v2543_v0  ;;  %v850_v8 = vcvt.s32.f32 %v848_v2  ;;  %v418_v2 = vld [vmem:[#allocation5] sm:$0xff] }
 0x20d   : > { %v813_v60 = vsel %vm812_vm9, %v808_v3, inf  ;;  %v864_v3 = vcvt.s32.f32 %v862_v61 }
 0x20e   : > { %814 = vmin.xlane.f32.xlu0 %v813_v60 }
 0x213   : > { %v2549_v18 = vpop.xlane.xlu2 %852  ;;  %v2551_v48 = vpop.xlane.xlu0 %824 }
 0x214   : > { %v2553_v16 = vpop.xlane.xlu1 %894  ;;  %vm854_vm10 = vcmp.eq.f32.partialorder %v2466_v4, %v2549_v18  ;;  %vm826_vm11 = vcmp.eq.f32.partialorder %v2464_v62, %v2551_v48  ;;  %v421_v4 = vld [vmem:[#allocation5 + $0x18] sm:$0xff] }
 0x215   : > { %v855_v42 = vsel %vm854_vm10, %v850_v8, inf  ;;  %v827_v30 = vsel %vm826_vm11, %v822_v52, inf  ;;  %vm896_vm12 = vcmp.eq.f32.partialorder %v2468_v37, %v2553_v16  ;;  %1032 = vmatpush.msra.mxu1 %v421_v4  ;;  %1659 = vmatpush.msrb.mxu3 %v421_v4 }
 0x216   : > { %856 = vmin.xlane.f32.xlu0 %v855_v42  ;;  %828 = vmin.xlane.f32.xlu1 %v827_v30  ;;  %v897_v60 = vsel %vm896_vm12, %v892_v43, inf }
 0x217   : > { %1033 = vmatpush.msra.mxu1 %v420_v1  ;;  %1660 = vmatpush.msrb.mxu3 %v420_v1 }
 0x219   : > { %1034 = vmatpush.msra.mxu1 %v419_v29  ;;  %1661 = vmatpush.msrb.mxu3 %v419_v29 }
 0x21b   : > { %v2564_v62 = vpop.xlane.xlu0 %866  ;;  %1035 = vmatpush.msra.mxu1 %v418_v2  ;;  %1662 = vmatpush.msrb.mxu3 %v418_v2 }
 0x21c   : > { %v2566_v49 = vpop.xlane.xlu1 %838  ;;  %vm868_vm13 = vcmp.eq.f32.partialorder %v2483_v47, %v2564_v62 }
 0x21d   : > { %vm840_vm14 = vcmp.eq.f32.partialorder %v2485_v13, %v2566_v49  ;;  %v869_v7 = vsel %vm868_vm13, %v864_v3, inf  ;;  %v878_v13 = vcvt.s32.f32 %v876_v10  ;;  %1663 = vmatpush.msra.mxu3 %v2257_v40  ;;  %v2600_v40 = vstv %s2591_s10 }
 0x21e   : > { %v841_v37 = vsel %vm840_vm14, %v836_v9, inf  ;;  %898 = vmin.xlane.f32.xlu0 %v897_v60  ;;  %870 = vmin.xlane.f32.xlu1 %v869_v7  ;;  %v733_v9 = vcvt.f32.s32 %v2513_v46 }
 0x21f   : > { %842 = vmin.xlane.f32.xlu2 %v841_v37  ;;  %1664 = vmatpush.msra.mxu3 %v2242_v35  ;;  %v691_v35 = vcvt.f32.s32 %v2498_v56 }
 0x220   : > { %v734_v2 = vshll.u32 %v733_v9, 16 }
 0x221   : > { %1665 = vmatpush.msra.mxu3 %v2232_v32 }
 0x223   : > { %v2573_v47 = vpop.xlane.xlu2 %880  ;;  %1666 = vmatpush.msra.mxu3 %v2220_v28  ;;  %v2909_v28 = vlaneseq }
 0x224   : > { %vm882_vm15 = vcmp.eq.f32.partialorder %v2494_v25, %v2573_v47  ;;  %v705_v25 = vcvt.f32.s32 %v2503_v36  ;;  %v719_v36 = vcvt.f32.s32 %v2508_v33 }
 0x225   : > { %v883_v50 = vsel %vm882_vm15, %v878_v13, inf  ;;  %1667 = vmatpush.msra.mxu3 %v2272_v44  ;;  %v2595_v32 = vshrl.u32 %v2909_v28, 7 }
 0x226   : > { %v720_v61 = vshll.u32 %v719_v36, 16 }
 0x227   : > { %884 = vmin.xlane.f32.xlu2 %v883_v50  ;;  %1668 = vmatpush.msra.mxu3 %v2253_v39  ;;  %v958_v33 = vadd.s32 24, %v2595_v32  ;;  %v959_v28 = vadd.s32 32, %v2595_v32 }
 0x229   : > { %1669 = vmatpush.msra.mxu3 %v2228_v31  ;;  %v972_v31 = vadd.s32 %v2600_v40, %v2595_v32 }
 0x22b   : > { %1670 = vmatpush.msra.mxu3 %v2250_v38  ;;  %v692_v38 = vshll.u32 %v691_v35, 16  ;;  %vm988_vm0 = vcmp.lt.s32.totalorder %v972_v31, 128  ;;  %v747_v35 = vcvt.f32.s32 %v2518_v55  ;;  %v960_v55 = vadd.s32 40, %v2595_v32 }
 0x22d   : > { %1671 = vmatpush.msra.mxu3 %v2238_v34 }
 0x22f   : > { %1672 = vmatpush.msra.mxu3 %v2213_v26  ;;  %v956_v26 = vadd.s32 8, %v2595_v32 }
 0x231   : > { %1673 = vmatpush.msra.mxu3 %v2216_v27  ;;  %v973_v56 = vadd.s32 %v2600_v40, %v956_v26  ;;  %v748_v26 = vshll.u32 %v747_v35, 16 }
 0x233   : > { %1674 = vmatpush.msra.mxu3 %v2207_v24  ;;  %vm989_vm2 = vcmp.lt.s32.totalorder %v973_v56, 128 }
 0x235   : > { %1675 = vmatpush.msra.mxu3 %v2201_v22  ;;  %v706_v22 = vshll.u32 %v705_v25, 16 }
 0x237   : > { %1676 = vmatpush.msra.mxu3 %v2196_v17  ;;  %v957_v17 = vadd.s32 16, %v2595_v32 }
 0x239   : > { %v689_v39 = vpop.xlane.xlu1 %688  ;;  %1677 = vmatpush.msra.mxu3 %v2191_v11 }
 0x23a   : > { %v690_v44 = vcvt.f32.s32 %v689_v39 }
 0x23b   : > { %1678 = vmatpush.msra.mxu3 %v2186_v5  ;;  %v974_v5 = vadd.s32 %v2600_v40, %v957_v17 }
 0x23c   : > { %v693_v34 = vadd.s32 %v692_v38, %v690_v44 }
 0x23d   : > { %vm990_vm4 = vcmp.lt.s32.totalorder %v974_v5, 128 }
 0x23e   : > { %vm904_vm1 = vcmp.eq.s32.totalorder %v2367_v41, %v693_v34 }
 0x23f   : > { %v1587_v27 = vsel %vm904_vm1, 1.0, %v2022_v21 }
 0x240   : > { %1604 = vmatmul.msk.f32.vlgmr.msra.gmra.mxu1 %vm988_vm0, %v1587_v27  ;;  %v1004_v52 = vsel %vm988_vm0, %v1587_v27, 0.0 }
 0x241   : > { %v703_v24 = vpop.xlane.xlu0 %702  ;;  %v1271_v11 = vmul.f32 %v1004_v52, %v2303_v53 }
 0x242   : > { %v704_v15 = vcvt.f32.s32 %v703_v24 }
 0x243   : > { %v1287_v4 = vmax.f32 %v1271_v11, 0.0 }
 0x244   : > { %v707_v8 = vadd.s32 %v706_v22, %v704_v15  ;;  %v761_v22 = vcvt.f32.s32 %v2523_v20  ;;  %v961_v20 = vadd.s32 48, %v2595_v32 }
 0x246   : > { %vm905_vm3 = vcmp.eq.s32.totalorder %v2367_v41, %v707_v8 }
 0x247   : > { %v1588_v14 = vsel %vm905_vm3, 1.0, %v2022_v21 }
 0x248   : > { %1605 = vmatmul.msk.f32.gmra.mxu1 %vm989_vm2, %v1588_v14  ;;  %v1005_v42 = vsel %vm989_vm2, %v1588_v14, 0.0  ;;  %v762_v14 = vshll.u32 %v761_v22, 16 }
 0x249   : > { %v717_v30 = vpop.xlane.xlu2 %716  ;;  %v1102_v58 = vadd.f32 %v1005_v42, %v1004_v52  ;;  %v1272_v45 = vmul.f32 %v1005_v42, %v2307_v59  ;;  %v975_v59 = vadd.s32 %v2600_v40, %v958_v33 }
 0x24a   : > { %v718_v54 = vcvt.f32.s32 %v717_v30 }
 0x24b   : > { %v1288_v43 = vmax.f32 %v1272_v45, 0.0  ;;  %vm991_vm6 = vcmp.lt.s32.totalorder %v975_v59, 128  ;;  %v775_v45 = vcvt.f32.s32 %v2528_v51  ;;  %v962_v51 = vadd.s32 56, %v2595_v32 }
 0x24c   : > { %v721_v3 = vadd.s32 %v720_v61, %v718_v54 }
 0x24d   : > { %v1303_v1 = vadd.f32 %v1288_v43, %v1287_v4 }
 0x24e   : > { %vm906_vm5 = vcmp.eq.s32.totalorder %v2367_v41, %v721_v3  ;;  %v776_v3 = vshll.u32 %v775_v45, 16  ;;  %v967_v45 = vadd.s32 96, %v2595_v32 }
 0x24f   : > { %v1589_v53 = vsel %vm906_vm5, 1.0, %v2022_v21 }
 0x250   : > { %1606 = vmatmul.msk.f32.gmra.mxu1 %vm990_vm4, %v1589_v53  ;;  %v1006_v29 = vsel %vm990_vm4, %v1589_v53, 0.0 }
 0x251   : > { %v731_v60 = vpop.xlane.xlu0 %730  ;;  %v1273_v7 = vmul.f32 %v1006_v29, %v2311_v63  ;;  %v1103_v37 = vadd.f32 %v1102_v58, %v1006_v29  ;;  %v976_v63 = vadd.s32 %v2600_v40, %v959_v28 }
 0x252   : > { %v732_v10 = vcvt.f32.s32 %v731_v60  ;;  %v789_v60 = vcvt.f32.s32 %v2533_v57  ;;  %v963_v57 = vadd.s32 64, %v2595_v32 }
 0x253   : > { %v1289_v13 = vmax.f32 %v1273_v7, 0.0  ;;  %vm992_vm8 = vcmp.lt.s32.totalorder %v976_v63, 128 }
 0x254   : > { %v735_v50 = vadd.s32 %v734_v2, %v732_v10  ;;  %v2910_v2 = vld [vmem:[#allocation18_spill] sm:$0xff] }
 0x255   : > { %v1304_v46 = vadd.f32 %v1303_v1, %v1289_v13  ;;  %v790_v13 = vshll.u32 %v789_v60, 16 }
 0x256   : > { %vm907_vm7 = vcmp.eq.s32.totalorder %v2367_v41, %v735_v50 }
 0x257   : > { %v1590_v39 = vsel %vm907_vm7, 1.0, %v2022_v21 }
 0x258   : > { %1141 = vxpose.xlu1.b32.start [1/16] %v1004_v52, 128  ;;  %1607 = vmatmul.msk.f32.gmra.mxu1 %vm991_vm6, %v1590_v39  ;;  %v1007_v31 = vsel %vm991_vm6, %v1590_v39, 0.0  ;;  %v803_v39 = vcvt.f32.s32 %v2538_v23  ;;  %v964_v23 = vadd.s32 72, %v2595_v32 }
 0x259   : > { %v745_v38 = vpop.xlane.xlu1 %744  ;;  %v1104_v44 = vadd.f32 %v1103_v37, %v1007_v31  ;;  %v1274_v34 = vmul.f32 %v1007_v31, %v2315_v6  ;;  %v977_v6 = vadd.s32 %v2600_v40, %v960_v55 }
 0x25a   : > { %v746_v25 = vcvt.f32.s32 %v745_v38 }
 0x25b   : > { %v1290_v27 = vmax.f32 %v1274_v34, 0.0  ;;  %vm993_vm10 = vcmp.lt.s32.totalorder %v977_v6, 128  ;;  %v2911_v34 = vld [vmem:[#allocation20_spill] sm:$0xff] }
 0x25c   : > { %v749_v24 = vadd.s32 %v748_v26, %v746_v25 }
 0x25d   : > { %v1305_v56 = vadd.f32 %v1304_v46, %v1290_v27  ;;  %v804_v27 = vshll.u32 %v803_v39, 16 }
 0x25e   : > { %vm908_vm9 = vcmp.eq.s32.totalorder %v2367_v41, %v749_v24 }
 0x25f   : > { %v1591_v15 = vsel %vm908_vm9, 1.0, %v2022_v21 }
 0x260   : > { %1142 = vxpose.xlu1.b32.cont [2/16] %v1005_v42, 128  ;;  %1608 = vmatmul.msk.f32.gmra.mxu1 %vm992_vm8, %v1591_v15  ;;  %v1008_v8 = vsel %vm992_vm8, %v1591_v15, 0.0  ;;  %v817_v15 = vcvt.f32.s32 %v2543_v0 }
 0x261   : > { %v759_v52 = vpop.xlane.xlu2 %758  ;;  %v1275_v17 = vmul.f32 %v1008_v8, %v2319_v12  ;;  %v1105_v36 = vadd.f32 %v1104_v44, %v1008_v8  ;;  %v978_v12 = vadd.s32 %v2600_v40, %v961_v20  ;;  %v980_v44 = vadd.s32 %v2600_v40, %v963_v57 }
 0x262   : > { %v760_v11 = vcvt.f32.s32 %v759_v52 }
 0x263   : > { %v1291_v30 = vmax.f32 %v1275_v17, 0.0  ;;  %vm994_vm12 = vcmp.lt.s32.totalorder %v978_v12, 128  ;;  %vm996_vm0 = vcmp.lt.s32.totalorder %v980_v44, 128  ;;  %v981_v17 = vadd.s32 %v2600_v40, %v964_v23 }
 0x264   : > { %v763_v5 = vadd.s32 %v762_v14, %v760_v11  ;;  %v970_v23 = vadd.s32 120, %v2595_v32 }
 0x265   : > { %v1306_v58 = vadd.f32 %v1305_v56, %v1291_v30  ;;  %v818_v30 = vshll.u32 %v817_v15, 16  ;;  %vm997_vm2 = vcmp.lt.s32.totalorder %v981_v17, 128  ;;  %v887_v15 = vcvt.f32.s32 %v2573_v47 }
 0x266   : > { %vm909_vm11 = vcmp.eq.s32.totalorder %v2367_v41, %v763_v5 }
 0x267   : > { %v1592_v42 = vsel %vm909_vm11, 1.0, %v2022_v21 }
 0x268   : > { %1143 = vxpose.xlu1.b32.cont [3/16] %v1006_v29, 128  ;;  %1609 = vmatmul.msk.f32.gmra.mxu1 %vm993_vm10, %v1592_v42  ;;  %v1009_v61 = vsel %vm993_vm10, %v1592_v42, 0.0 }
 0x269   : > { %v773_v54 = vpop.xlane.xlu0 %772  ;;  %v1276_v4 = vmul.f32 %v1009_v61, %v2323_v19  ;;  %v1106_v43 = vadd.f32 %v1105_v36, %v1009_v61  ;;  %v979_v19 = vadd.s32 %v2600_v40, %v962_v51  ;;  %v2912_v36 = vld [vmem:[#allocation21_spill] sm:$0xff]  ;;  %v2913_v51 = vld [vmem:[#allocation22_spill] sm:$0xff] }
 0x26a   : > { %v774_v33 = vcvt.f32.s32 %v773_v54  ;;  %v831_v54 = vcvt.f32.s32 %v2551_v48 }
 0x26b   : > { %v1292_v1 = vmax.f32 %v1276_v4, 0.0  ;;  %vm995_vm14 = vcmp.lt.s32.totalorder %v979_v19, 128 }
 0x26c   : > { %v777_v9 = vadd.s32 %v776_v3, %v774_v33 }
 0x26d   : > { %v1307_v53 = vadd.f32 %v1306_v58, %v1292_v1  ;;  %v965_v58 = vadd.s32 80, %v2595_v32  ;;  %v984_v1 = vadd.s32 %v2600_v40, %v967_v45 }
 0x26e   : > { %vm910_vm13 = vcmp.eq.s32.totalorder %v2367_v41, %v777_v9 }
 0x26f   : > { %v1593_v29 = vsel %vm910_vm13, 1.0, %v2022_v21  ;;  %v982_v33 = vadd.s32 %v2600_v40, %v965_v58  ;;  %vm1000_vm5 = vcmp.lt.s32.totalorder %v984_v1, 128  ;;  %v2916_v58 = vld [vmem:[#allocation26_spill] sm:$0xff] }
 0x270   : > { %1144 = vxpose.xlu1.b32.cont [4/16] %v1007_v31, 128  ;;  %1610 = vmatmul.msk.f32.gmra.mxu1 %vm994_vm12, %v1593_v29  ;;  %v1010_v59 = vsel %vm994_vm12, %v1593_v29, 0.0 }
 0x271   : > { %v787_v7 = vpop.xlane.xlu1 %786  ;;  %v1107_v37 = vadd.f32 %v1106_v43, %v1010_v59  ;;  %v1277_v10 = vmul.f32 %v1010_v59, %v2910_v2  ;;  %v873_v2 = vcvt.f32.s32 %v2564_v62  ;;  %vm998_vm4 = vcmp.lt.s32.totalorder %v982_v33, 128 }
 0x272   : > { %v788_v50 = vcvt.f32.s32 %v787_v7 }
 0x273   : > { %v1293_v28 = vmax.f32 %v1277_v10, 0.0 }
 0x274   : > { %v791_v46 = vadd.s32 %v790_v13, %v788_v50  ;;  %v966_v13 = vadd.s32 88, %v2595_v32  ;;  %v968_v50 = vadd.s32 104, %v2595_v32 }
 0x275   : > { %v1308_v35 = vadd.f32 %v1307_v53, %v1293_v28  ;;  %v832_v53 = vshll.u32 %v831_v54, 16  ;;  %v845_v28 = vcvt.f32.s32 %v2566_v49 }
 0x276   : > { %vm911_vm15 = vcmp.eq.s32.totalorder %v2367_v41, %v791_v46 }
 0x277   : > { %v1594_v31 = vsel %vm911_vm15, 1.0, %v2022_v21 }
 0x278   : > { %1145 = vxpose.xlu1.b32.cont [5/16] %v1008_v8, 128  ;;  %1611 = vmatmul.msk.f32.gmra.mxu1 %vm995_vm14, %v1594_v31  ;;  %v1011_v38 = vsel %vm995_vm14, %v1594_v31, 0.0 }
 0x279   : > { %v801_v63 = vpop.xlane.xlu2 %800  ;;  %v1278_v26 = vmul.f32 %v1011_v38, %v2911_v34  ;;  %v1108_v25 = vadd.f32 %v1107_v37, %v1011_v38 }
 0x27a   : > { %v802_v24 = vcvt.f32.s32 %v801_v63  ;;  %v2914_v63 = vld [vmem:[#allocation24_spill] sm:$0xff] }
 0x27b   : > { %v1294_v55 = vmax.f32 %v1278_v26, 0.0 }
 0x27c   : > { %v805_v56 = vadd.s32 %v804_v27, %v802_v24  ;;  %v983_v27 = vadd.s32 %v2600_v40, %v966_v13  ;;  %v846_v24 = vshll.u32 %v845_v28, 16 }
 0x27d   : > { %v1309_v22 = vadd.f32 %v1308_v35, %v1294_v55  ;;  %v874_v35 = vshll.u32 %v873_v2, 16 }
 0x27e   : > { %vm912_vm1 = vcmp.eq.s32.totalorder %v2367_v41, %v805_v56  ;;  %vm999_vm8 = vcmp.lt.s32.totalorder %v983_v27, 128 }
 0x27f   : > { %v1595_v8 = vsel %vm912_vm1, 1.0, %v2022_v21 }
 0x280   : > { %1146 = vxpose.xlu1.b32.cont [6/16] %v1009_v61, 128  ;;  %1612 = vmatmul.msk.f32.gmra.mxu1 %vm996_vm0, %v1595_v8  ;;  %v2662_v52 = vsel %vm996_vm0, %v1595_v8, 0.0  ;;  %v859_v61 = vcvt.f32.s32 %v2549_v18  ;;  %vm399_vm0 = vcmask 0  }
 0x281   : > { %v815_v6 = vpop.xlane.xlu0 %814  ;;  %v1279_v14 = vmul.f32 %v2662_v52, %v2912_v36  ;;  %v1109_v11 = vadd.f32 %v1108_v25, %v2662_v52  ;;  %v969_v36 = vadd.s32 112, %v2595_v32  ;;  %400 = vst.msk [vmem:[%s377_s17] sm:$0x1] %vm399_vm0, %v2022_v21 }
 0x282   : > { %v816_v5 = vcvt.f32.s32 %v815_v6  ;;  %v860_v48 = vshll.u32 %v859_v61, 16 }
 0x283   : > { %v1295_v20 = vmax.f32 %v1279_v14, 0.0  ;;  %v986_v61 = vadd.s32 %v2600_v40, %v969_v36 }
 0x284   : > { %v819_v0 = vadd.s32 %v818_v30, %v816_v5  ;;  %v987_v30 = vadd.s32 %v2600_v40, %v970_v23 }
 0x285   : > { %v1310_v42 = vadd.f32 %v1309_v22, %v1295_v20  ;;  %vm1002_vm14 = vcmp.lt.s32.totalorder %v986_v61, 128 }
 0x286   : > { %vm913_vm3 = vcmp.eq.s32.totalorder %v2367_v41, %v819_v0  ;;  %v2915_v0 = vld [vmem:[#allocation19_spill] sm:$0xff]  ;;  %vm1003_vm13 = vcmp.lt.s32.totalorder %v987_v30, 128 }
 0x287   : > { %v1596_v12 = vsel %vm913_vm3, 1.0, %v2022_v21 }
 0x288   : > { %1147 = vxpose.xlu1.b32.cont [7/16] %v1010_v59, 128  ;;  %1613 = vmatmul.msk.f32.gmra.mxu1 %vm997_vm2, %v1596_v12  ;;  %v2674_v4 = vsel %vm997_vm2, %v1596_v12, 0.0  ;;  %v901_v59 = vcvt.f32.s32 %v2553_v16  ;;  %v888_v12 = vshll.u32 %v887_v15, 16 }
 0x289   : > { %v829_v43 = vpop.xlane.xlu1 %828  ;;  %v857_v3 = vpop.xlane.xlu0 %856  ;;  %v1110_v9 = vadd.f32 %v1109_v11, %v2674_v4  ;;  %v1280_v18 = vmul.f32 %v2674_v4, %v2913_v51 }
 0x28a   : > { %v830_v60 = vcvt.f32.s32 %v829_v43  ;;  %v858_v29 = vcvt.f32.s32 %v857_v3  ;;  %v902_v57 = vshll.u32 %v901_v59, 16  ;;  %v2917_v3 = vld [vmem:[#allocation25_spill] sm:$0xff] }
 0x28b   : > { %v1296_v7 = vmax.f32 %v1280_v18, 0.0 }
 0x28c   : > { %v833_v19 = vadd.s32 %v832_v53, %v830_v60  ;;  %v861_v37 = vadd.s32 %v860_v48, %v858_v29 }
 0x28d   : > { %v1311_v10 = vadd.f32 %v1310_v42, %v1296_v7 }
 0x28e   : > { %vm914_vm6 = vcmp.eq.s32.totalorder %v2367_v41, %v833_v19  ;;  %vm916_vm7 = vcmp.eq.s32.totalorder %v2367_v41, %v861_v37  ;;  %v2918_v19 = vld [vmem:[#allocation27_spill] sm:$0xff] }
 0x28f   : > { %v1597_v46 = vsel %vm914_vm6, 1.0, %v2022_v21  ;;  %v1599_v16 = vsel %vm916_vm7, 1.0, %v2022_v21 }
 0x290   : > { %1148 = vxpose.xlu1.b32.cont [8/16] %v1011_v38, 128  ;;  %1614 = vmatmul.msk.f32.gmra.mxu1 %vm998_vm4, %v1597_v46  ;;  %v2690_v62 = vsel %vm998_vm4, %v1597_v46, 0.0  ;;  %v985_v38 = vadd.s32 %v2600_v40, %v968_v50  ;;  %v1016_v14 = vsel %vm1000_vm5, %v1599_v16, 0.0 }
 0x291   : > { %1616 = vmatmul.msk.f32.vlgmr.msrb.gmra.mxu3 %vm1000_vm5, %v1599_v16  ;;  %v871_v39 = vpop.xlane.xlu1 %870  ;;  %v899_v31 = vpop.xlane.xlu0 %898  ;;  %v1281_v44 = vmul.f32 %v2690_v62, %v2914_v63  ;;  %v1111_v34 = vadd.f32 %v1110_v9, %v2690_v62  ;;  %v1283_v32 = vmul.f32 %v1016_v14, %v2915_v0 }
 0x292   : > { %v843_v49 = vpop.xlane.xlu2 %842  ;;  %v872_v26 = vcvt.f32.s32 %v871_v39  ;;  %v900_v25 = vcvt.f32.s32 %v899_v31  ;;  %vm1001_vm10 = vcmp.lt.s32.totalorder %v985_v38, 128 }
 0x293   : > { %v844_v55 = vcvt.f32.s32 %v843_v49  ;;  %v1297_v56 = vmax.f32 %v1281_v44, 0.0  ;;  %v1299_v18 = vmax.f32 %v1283_v32, 0.0  ;;  %v1101_v44 = vld [vmem:[%s2582_s9] sm:$0x1] }
 0x294   : > { %v875_v22 = vadd.s32 %v874_v35, %v872_v26  ;;  %v903_v6 = vadd.s32 %v902_v57, %v900_v25 }
 0x295   : > { %v847_v8 = vadd.s32 %v846_v24, %v844_v55  ;;  %v1312_v17 = vadd.f32 %v1311_v10, %v1297_v56  ;;  %v2919_v10 = vld [vmem:[#allocation23_spill] sm:$0xff] }
 0x296   : > { %vm917_vm9 = vcmp.eq.s32.totalorder %v2367_v41, %v875_v22  ;;  %vm919_vm12 = vcmp.eq.s32.totalorder %v2367_v41, %v903_v6 }
 0x297   : > { %vm915_vm11 = vcmp.eq.s32.totalorder %v2367_v41, %v847_v8  ;;  %v1600_v11 = vsel %vm917_vm9, 1.0, %v2022_v21  ;;  %v1602_v9 = vsel %vm919_vm12, 1.0, %v2022_v21 }
 0x298   : > { %1149 = vxpose.xlu1.b32.cont [9/16] %v2662_v52, 128  ;;  %v1598_v47 = vsel %vm915_vm11, 1.0, %v2022_v21  ;;  %v1017_v20 = vsel %vm1001_vm10, %v1600_v11, 0.0  ;;  %v1019_v60 = vsel %vm1003_vm13, %v1602_v9, 0.0 }
 0x299   : > { %v1015_v5 = vsel %vm999_vm8, %v1598_v47, 0.0  ;;  %1615 = vmatmul.msk.f32.gmra.mxu1 %vm999_vm8, %v1598_v47  ;;  %1617 = vmatmul.msk.f32.gmra.mxu3 %vm1001_vm10, %v1600_v11  ;;  %v1284_v33 = vmul.f32 %v1017_v20, %v2917_v3  ;;  %v1286_v13 = vmul.f32 %v1019_v60, %v2919_v10 }
 0x29a   : > { %v1282_v45 = vmul.f32 %v1015_v5, %v2916_v58  ;;  %v885_v42 = vpop.xlane.xlu2 %884  ;;  %v1112_v54 = vadd.f32 %v1111_v34, %v1015_v5 }
 0x29b   : > { %v886_v43 = vcvt.f32.s32 %v885_v42  ;;  %v1300_v40 = vmax.f32 %v1284_v33, 0.0  ;;  %v1302_v16 = vmax.f32 %v1286_v13, 0.0 }
 0x29c   : > { %v1298_v52 = vmax.f32 %v1282_v45, 0.0  ;;  %v1113_v1 = vadd.f32 %v1112_v54, %v1016_v14 }
 0x29d   : > { %v889_v51 = vadd.s32 %v888_v12, %v886_v43 }
 0x29e   : > { %v1313_v48 = vadd.f32 %v1312_v17, %v1298_v52  ;;  %v1114_v53 = vadd.f32 %v1113_v1, %v1017_v20 }
 0x29f   : > { %vm918_vm15 = vcmp.eq.s32.totalorder %v2367_v41, %v889_v51  ;;  %v1270_v51 = vld [vmem:[%s377_s17] sm:$0x1] }
 0x2a0   : > { %1150 = vxpose.xlu1.b32.cont [10/16] %v2674_v4, 128  ;;  %v1601_v29 = vsel %vm918_vm15, 1.0, %v2022_v21  ;;  %v1314_v7 = vadd.f32 %v1313_v48, %v1299_v18 }
 0x2a1   : > { %v1018_v59 = vsel %vm1002_vm14, %v1601_v29, 0.0  ;;  %1618 = vmatmul.msk.f32.gmra.mxu3 %vm1002_vm14, %v1601_v29 }
 0x2a2   : > { %v1285_v37 = vmul.f32 %v1018_v59, %v2918_v19  ;;  %v1115_v2 = vadd.f32 %v1114_v53, %v1018_v59  ;;  %v1315_v50 = vadd.f32 %v1314_v7, %v1300_v40 }
 0x2a4   : > { %v1116_v28 = vadd.f32 %v1115_v2, %v1019_v60  ;;  %v1301_v46 = vmax.f32 %v1285_v37, 0.0 }
 0x2a6   : > { %v1117_v41 = vrot.slane %v1116_v28, 4  ;;  %v1316_v57 = vadd.f32 %v1315_v50, %v1301_v46 }
 0x2a8   : > { %1151 = vxpose.xlu1.b32.cont [11/16] %v2690_v62, 128  ;;  %v1118_v4 = vadd.f32 %v1117_v41, %v1116_v28  ;;  %v1317_v35 = vadd.f32 %v1316_v57, %v1302_v16 }
 0x2a9   : > { %1619 = vmatmul.msk.f32.gmra.mxu3 %vm1003_vm13, %v1602_v9 }
 0x2aa   : > { %v1119_v39 = vrot.slane %v1118_v4, 2  ;;  %1318 = vadd.xlane.f32.xlu2 %v1317_v35 }
 0x2ac   : > { %v1120_v31 = vadd.f32 %v1119_v39, %v1118_v4 }
 0x2ae   : > { %v1121_v63 = vrot.slane %v1120_v31, 1 }
 0x2b0   : > { %v1122_v34 = vadd.f32 %v1121_v63, %v1120_v31  ;;  %1152 = vxpose.xlu1.b32.cont [12/16] %v1015_v5, 128 }
 0x2b2   : > { %v1123_v49 = vadd.f32 %v1122_v34, %v1101_v44 }
 0x2b4   : > { %1124 = vst [vmem:[%s2582_s9] sm:$0x1] %v1123_v49 }
 0x2b8   : > { %1153 = vxpose.xlu1.b32.cont [13/16] %v1016_v14, 128 }
 0x2bd   : > { %v1037_v26 = vpop.f32.mrf.mxu1 }
 0x2be   : > { %1085 = vst [vmem:[%s2725_s14] sm:$0xff] %v1037_v26 }
 0x2c0   : > { %1154 = vxpose.xlu1.b32.cont [14/16] %v1017_v20, 128 }
 0x2c5   : > { %v1040_v62 = vpop.f32.mrf.mxu1 }
 0x2c6   : > { %1086 = vst [vmem:[%s2725_s14 + $0x8] sm:$0xff] %v1040_v62 }
 0x2c8   : > { %1155 = vxpose.xlu1.b32.cont [15/16] %v1018_v59, 128 }
 0x2cd   : > { %v1043_v25 = vpop.f32.mrf.mxu1 }
 0x2ce   : > { %1087 = vst [vmem:[%s2725_s14 + $0x10] sm:$0xff] %v1043_v25 }
 0x2d0   : > { %1156 = vxpose.xlu1.b32.end [16/16] %v1019_v60, 128 }
 0x2d5   : > { %v1046_v27 = vpop.f32.mrf.mxu1 }
 0x2d6   : > { %1088 = vst [vmem:[%s2725_s14 + $0x18] sm:$0xff] %v1046_v27 }
 0x2dd   : > { %v1049_v38 = vpop.f32.mrf.mxu1 }
 0x2de   : > { %1089 = vst [vmem:[%s2725_s14 + $0x20] sm:$0xff] %v1049_v38 }
 0x2e5   : > { %v1052_v24 = vpop.f32.mrf.mxu1 }
 0x2e6   : > { %1090 = vst [vmem:[%s2725_s14 + $0x28] sm:$0xff] %v1052_v24 }
 0x2ed   : > { %v1055_v55 = vpop.f32.mrf.mxu1 }
 0x2ee   : > { %1091 = vst [vmem:[%s2725_s14 + $0x30] sm:$0xff] %v1055_v55 }
 0x2f5   : > { %v1058_v56 = vpop.f32.mrf.mxu1 }
 0x2f6   : > { %1092 = vst [vmem:[%s2725_s14 + $0x38] sm:$0xff] %v1058_v56 }
 0x2fc   : > { %v1157_v23 = vpop.trf.xlu1 }
 0x2fd   : > { %v1061_v22 = vpop.f32.mrf.mxu1  ;;  %1189 = vmatmul.f32.vlgmr.msra.gmra.mxu2 %v1157_v23 }
 0x2fe   : > { %1093 = vst [vmem:[%s2725_s14 + $0x40] sm:$0xff] %v1061_v22 }
 0x304   : > { %v1158_v15 = vpop.trf.xlu1 }
 0x305   : > { %v1064_v8 = vpop.f32.mrf.mxu1  ;;  %1192 = vmatmul.f32.gmra.mxu2 %v1158_v15 }
 0x306   : > { %1094 = vst [vmem:[%s2725_s14 + $0x48] sm:$0xff] %v1064_v8 }
 0x30c   : > { %v1159_v6 = vpop.trf.xlu1 }
 0x30d   : > { %v1067_v17 = vpop.f32.mrf.mxu1  ;;  %1195 = vmatmul.f32.gmra.mxu2 %v1159_v6 }
 0x30e   : > { %1095 = vst [vmem:[%s2725_s14 + $0x50] sm:$0xff] %v1067_v17 }
 0x314   : > { %v1073_v36 = vpop.f32.mrf.mxu3  ;;  %v1160_v14 = vpop.trf.xlu1 }
 0x315   : > { %1097 = vst [vmem:[%s2725_s14 + $0x60] sm:$0xff] %v1073_v36  ;;  %1198 = vmatmul.f32.gmra.mxu2 %v1160_v14 }
 0x316   : > { %v1070_v11 = vpop.f32.mrf.mxu1 }
 0x317   : > { %1096 = vst [vmem:[%s2725_s14 + $0x58] sm:$0xff] %v1070_v11 }
 0x31c   : > { %v1076_v30 = vpop.f32.mrf.mxu3  ;;  %v1161_v47 = vpop.trf.xlu1 }
 0x31d   : > { %1098 = vst [vmem:[%s2725_s14 + $0x68] sm:$0xff] %v1076_v30  ;;  %v1319_v5 = vpop.xlane.xlu2 %1318  ;;  %1201 = vmatmul.f32.gmra.mxu2 %v1161_v47 }
 0x31e   : > { %v1320_v20 = vrot.slane %v1319_v5, 4 }
 0x320   : > { %v1321_v0 = vadd.f32 %v1320_v20, %v1319_v5 }
 0x322   : > { %v1322_v32 = vrot.slane %v1321_v0, 2 }
 0x324   : > { %v1079_v58 = vpop.f32.mrf.mxu3  ;;  %v1162_v45 = vpop.trf.xlu1  ;;  %v1323_v42 = vadd.f32 %v1322_v32, %v1321_v0 }
 0x325   : > { %1099 = vst [vmem:[%s2725_s14 + $0x70] sm:$0xff] %v1079_v58  ;;  %1204 = vmatmul.f32.gmra.mxu2 %v1162_v45 }
 0x326   : > { %v1324_v61 = vrot.slane %v1323_v42, 1 }
 0x328   : > { %v1325_v54 = vadd.f32 %v1324_v61, %v1323_v42 }
 0x32a   : > { %1679 = vpush %v1325_v54 }
 0x32c   : > { %v1082_v12 = vpop.f32.mrf.mxu3  ;;  %v1163_v43 = vpop.trf.xlu1 }
 0x32d   : > { %1100 = vst [vmem:[%s2725_s14 + $0x78] sm:$0xff] %v1082_v12  ;;  %1207 = vmatmul.f32.gmra.mxu2 %v1163_v43 }
 0x334   : > { %v1164_v52 = vpop.trf.xlu1 }
 0x335   : > { %1210 = vmatmul.f32.gmra.mxu2 %v1164_v52 }
 0x33c   : > { %v1165_v3 = vpop.trf.xlu1 }
 0x33d   : > { %1213 = vmatmul.f32.gmra.mxu2 %v1165_v3 }
 0x344   : > { %v1166_v33 = vpop.trf.xlu1 }
 0x345   : > { %1216 = vmatmul.f32.gmra.mxu2 %v1166_v33 }
 0x34c   : > { %v1167_v1 = vpop.trf.xlu1 }
 0x34d   : > { %1219 = vmatmul.f32.gmra.mxu2 %v1167_v1 }
 0x354   : > { %v1168_v9 = vpop.trf.xlu1 }
 0x355   : > { %1222 = vmatmul.f32.gmra.mxu2 %v1168_v9 }
 0x35b   : > { %s1680_s18 = spop %1679 }
 0x35c   : > { %v1327_v18 = vstv %s1680_s18  ;;  %v1169_v48 = vpop.trf.xlu1  ;;  %s1357_s18 = sshll.u32 %s2725_s14, 4  ;;  %s1358_s18 = int_to_ptr.vmem [resolvable:$true] %s1357_s18 }
 0x35d   : > { %v1328_v53 = vadd.f32 %v1327_v18, %v1270_v51  ;;  %1225 = vmatmul.f32.vlgmr.msra.gmra.mxu3 %v1169_v48 }
 0x35f   : > { %1330 = vst.msk [vmem:[%s377_s17] sm:$0x1] %vm399_vm0, %v1328_v53  ;;  %s1375_s17 = sshll.u32 %s1371_s20, 4  ;;  %s1376_s17 = int_to_ptr.hbm [resolvable:$true] %s1375_s17 }
 0x360   : > { %s1884_s22 = sshra.s32 %s1376_s17, 4  ;;  %s1885_s22 = int_to_ptr.hbm [resolvable:$true] %s1884_s22 }
 0x361   : > { %s1886_s23 = scalar_lea.hbm %s1885_s22, 1  ;;  %p1891_p12 = scmp.lt.s32.totalorder %s1885_s22, %s2864_s5 }
 0x362   : > { %p1887_p3 = scmp.ne.s32.totalorder %s1885_s22, %s1886_s23  ;;  %p1892_p13 = scmp.lt.s32.totalorder %s1890_s1, %s1886_s23 }
 0x364   : > { %v1170_v21 = vpop.trf.xlu1  ;;  %p1888_p7 = pnand %p1887_p3, %p2145_p2  ;;  %p1893_p0 = por %p1892_p13, %p1891_p12 }
 0x365   : > { %1228 = vmatmul.f32.gmra.mxu3 %v1170_v21 }
 0x366   : > { %p1889_p11 = pneg %p1888_p7 }
 0x368   : > { %p1894_p4 = pnand %p1893_p0, %p1889_p11 }
 0x36c   : > { %v1171_v60 = vpop.trf.xlu1 }
 0x36d   : > { %1231 = vmatmul.f32.gmra.mxu3 %v1171_v60 }
 0x374   : > { %v1172_v40 = vpop.trf.xlu1 }
 0x375   : > { %1234 = vmatmul.f32.gmra.mxu3 %v1172_v40 }
 0x376   : > { %1897 = shalt.err (!%p1894_p4)
}
 0x377   : > { %s2921_s9 = sld [smem:[#allocation28_spill]]  ;;  %s1332_s14 = scalar_lea.sflag [#allocation4], %s2168_s12 }
 0x378   : > { %1692 = dma.vmem_to_hbm [thread:$0]  (%p2145_p2), %s1374_s16, 16, %s1376_s17, %s2765_s0  }
 0x379   : > { %s1918_s23 = scalar_lea.hbm %s2863_s4, 256 }
 0x37d   : > { %s2922_s15 = int_to_ptr.hbm [resolvable:$true] %s2921_s9 }
 0x37e   : > { %s1912_s2 = sshra.s32 %s2922_s15, 4  ;;  %s1913_s2 = int_to_ptr.hbm [resolvable:$true] %s1912_s2 }
 0x37f   : > { %s1914_s20 = scalar_lea.hbm %s1913_s2, 128  ;;  %p1919_p1 = scmp.lt.s32.totalorder %s1913_s2, %s2863_s4 }
 0x380   : > { %v1190_v29 = vpop.f32.mrf.mxu2  ;;  %p1915_p6 = scmp.ne.s32.totalorder %s1913_s2, %s1914_s20  ;;  %p1920_p3 = scmp.lt.s32.totalorder %s1918_s23, %s1914_s20 }
 0x382   : > { %p1916_p8 = pnand %p1915_p6, %p2145_p2  ;;  %p1921_p7 = por %p1920_p3, %p1919_p1 }
 0x384   : > { %p1917_p9 = pneg %p1916_p8 }
 0x386   : > { %p1922_p11 = pnand %p1921_p7, %p1917_p9 }
 0x388   : > { %1925 = shalt.err (!%p1922_p11)
}
 0x389   : > { %s2023_s12 = smov 128   ;;  %s2024_s16 = smov 8   ;;  %v1193_v7 = vpop.f32.mrf.mxu2 }
 0x38a   : > { %s2923_s17 = smov %s2922_s15  ;;  %s2797_s27 = scalar_lea.vmem [#allocation11], %s2171_s8 }
 0x38b   : > { %1691 = dma.vmem_to_hbm [thread:$0]  (%p2145_p2), %s1358_s18, 2048, %s2923_s17, %s1332_s14, %s2023_s12, %s2023_s12, %s2024_s16  }
 0x38c   : > { %1254 = vst [vmem:[%s2797_s27] sm:$0xff] %v1190_v29  ;;  %s1386_s30 = scalar_lea.hbm %s2865_s6, %s2591_s10  ;;  %s1387_s14 = sshll.u32 %s2797_s27, 4  ;;  %s1388_s14 = int_to_ptr.vmem [resolvable:$true] %s1387_s14 }
 0x38d   : > { %1255 = vst [vmem:[%s2797_s27 + $0x8] sm:$0xff] %v1193_v7  ;;  %s1389_s9 = sshll.u32 %s1386_s30, 4  ;;  %s1946_s22 = scalar_lea.hbm %s2865_s6, 256  ;;  %s1390_s9 = int_to_ptr.hbm [resolvable:$true] %s1389_s9 }
 0x38e   : > { %s1940_s15 = sshra.s32 %s1390_s9, 4  ;;  %s1941_s15 = int_to_ptr.hbm [resolvable:$true] %s1940_s15 }
 0x38f   : > { %s1942_s2 = scalar_lea.hbm %s1941_s15, 128  ;;  %p1947_p4 = scmp.lt.s32.totalorder %s1941_s15, %s2865_s6 }
 0x390   : > { %p1943_p12 = scmp.ne.s32.totalorder %s1941_s15, %s1942_s2  ;;  %p1948_p6 = scmp.lt.s32.totalorder %s1946_s22, %s1942_s2 }
 0x391   : > { %v1196_v59 = vpop.f32.mrf.mxu2 }
 0x392   : > { %1256 = vst [vmem:[%s2797_s27 + $0x10] sm:$0xff] %v1196_v59  ;;  %p1944_p13 = pnand %p1943_p12, %p2145_p2  ;;  %p1949_p8 = por %p1948_p6, %p1947_p4 }
 0x394   : > { %p1945_p0 = pneg %p1944_p13 }
 0x396   : > { %p1950_p9 = pnand %p1949_p8, %p1945_p0 }
 0x399   : > { %v1199_v19 = vpop.f32.mrf.mxu2 }
 0x39a   : > { %1257 = vst [vmem:[%s2797_s27 + $0x18] sm:$0xff] %v1199_v19 }
 0x3a1   : > { %v1202_v37 = vpop.f32.mrf.mxu2 }
 0x3a2   : > { %1258 = vst [vmem:[%s2797_s27 + $0x20] sm:$0xff] %v1202_v37 }
 0x3a9   : > { %v1205_v2 = vpop.f32.mrf.mxu2 }
 0x3aa   : > { %1259 = vst [vmem:[%s2797_s27 + $0x28] sm:$0xff] %v1205_v2 }
 0x3b1   : > { %v1208_v10 = vpop.f32.mrf.mxu2 }
 0x3b2   : > { %1260 = vst [vmem:[%s2797_s27 + $0x30] sm:$0xff] %v1208_v10 }
 0x3b9   : > { %v1211_v13 = vpop.f32.mrf.mxu2 }
 0x3ba   : > { %1261 = vst [vmem:[%s2797_s27 + $0x38] sm:$0xff] %v1211_v13 }
 0x3c1   : > { %v1214_v50 = vpop.f32.mrf.mxu2 }
 0x3c2   : > { %1262 = vst [vmem:[%s2797_s27 + $0x40] sm:$0xff] %v1214_v50 }
 0x3c9   : > { %v1217_v28 = vpop.f32.mrf.mxu2 }
 0x3ca   : > { %1263 = vst [vmem:[%s2797_s27 + $0x48] sm:$0xff] %v1217_v28 }
 0x3d1   : > { %v1220_v46 = vpop.f32.mrf.mxu2 }
 0x3d2   : > { %1264 = vst [vmem:[%s2797_s27 + $0x50] sm:$0xff] %v1220_v46 }
 0x3d9   : > { %v1223_v41 = vpop.f32.mrf.mxu2 }
 0x3da   : > { %1265 = vst [vmem:[%s2797_s27 + $0x58] sm:$0xff] %v1223_v41 }
 0x3e0   : > { %v1226_v16 = vpop.f32.mrf.mxu3 }
 0x3e1   : > { %1266 = vst [vmem:[%s2797_s27 + $0x60] sm:$0xff] %v1226_v16 }
 0x3e8   : > { %v1229_v57 = vpop.f32.mrf.mxu3 }
 0x3e9   : > { %1267 = vst [vmem:[%s2797_s27 + $0x68] sm:$0xff] %v1229_v57 }
 0x3f0   : > { %v1232_v4 = vpop.f32.mrf.mxu3 }
 0x3f1   : > { %1268 = vst [vmem:[%s2797_s27 + $0x70] sm:$0xff] %v1232_v4 }
 0x3f8   : > { %v1235_v35 = vpop.f32.mrf.mxu3 }
 0x3f9   : > { %1269 = vst [vmem:[%s2797_s27 + $0x78] sm:$0xff] %v1235_v35 }
 0x3fa   : > { %1953 = shalt.err (!%p1950_p9)
}
 0x3fb   : > { %1693 = dma.vmem_to_hbm [thread:$0]  (%p2145_p2), %s1388_s14, 2048, %s1390_s9, %s2765_s0, %s2023_s12, %s2023_s12, %s2024_s16  }
 0x3fc PF: > { %s1407_s1 = sand.u32 1, %s1996_s24   ;;  %p1709_p1 = pnand %p1577_p10, %p2111_p5 }
 0x3fd   : > { %s1408_s17 = scalar_lea.sflag [#allocation4], %s1407_s1 }
 0x3fe   : > { %p1710_p3 = pneg %p1709_p1 }
 0x400   : > { %1987 = dma.done.wait (%p1710_p3), %s1408_s17, 2048  }
 0x401   : > { %1989 = vsyncadd (%p1710_p3), %s1408_s17, 4294965248  ;;  %s2925_s27 = sadd.s32 4294967294, %s2016_s29  }
 0x402   : > { %s1417_s13 = sand.u32 1, %s2925_s27  }
 0x403   : > { %s1418_s8 = scalar_lea.sflag [#allocation10], %s1417_s13 }
 0x404   : > { %1991 = dma.done.wait (%p1710_p3), %s1418_s8, 2064  }
 0x405   : > { %1993 = vsyncadd (%p1710_p3), %s1418_s8, 4294965232  ;;  %s28_s29 = sadd.s32 1, %s2016_s29   ;;  %s2926_s0 = sld [smem:[#allocation17_spill]] }
 0x406   : > { %p25_p2 = scmp.ge.s32.totalorder %s28_s29, 4   ;;  %s2927_s24 = smov %s2000_s25 }
 0x407   : > { %s2928_s25 = smov %s2004_s26  ;;  %s2929_s26 = smov %s2155_s19 }
 0x408   : > { %s2930_s27 = smov %s2012_s28  ;;  %27 = sbr.rel (!%p25_p2) target bundleno = 13 (0xd), region = 137 }
 0x40b   : > { %s2931_s28 = smov %s2926_s0 }
 0x40d   :  { %1439 = vsyncpa [#allocation3], 1 }
 0x40e   :  { %1441 = vsyncpa [#allocation3 + $0x1], 1 }
 0x40f   :  { %1442 = vsyncpa [#allocation6], 1 }
 0x410   :  { %1443 = vsyncpa [#allocation4], 1 }
 0x411   :  { %1445 = vsyncpa [#allocation4 + $0x1], 1 }
 0x412   :  { %1446 = vsyncpa [#allocation10], 1 }
 0x413   :  { %1448 = vsyncpa [#allocation10 + $0x1], 1 }

</bundles_post_ra>
